<compile_context>
chip_gen: v7x
topology: tpu7x:2x2x1
jax: 0.10.0
libtpu: 0.0.40
codegen_flags: <defaults>
</compile_context>

<pallas_src>
import jax
import jax.numpy as jnp
from jax.experimental import pallas as pl
from jax.experimental.pallas import tpu as pltpu


def gcn_kernel(dinv_row_ref, a_ref, x_ref, wt_ref, o_ref):
    # dinv_row_ref: [TM, 1]     D^{-1/2} for this row tile (target nodes)
    # a_ref:        [TM, TK]    bf16 A_hat tile (0/1/2 entries, exact in bf16)
    # x_ref:        [TK, Fin]   source features, already scaled by D^{-1/2}
    # wt_ref:       [Fin, Fpad] W^T zero-padded to a lane-dense 128 width
    # o_ref:        [TM, Fpad]  f32 output tile (resident across k -> accumulator)
    k = pl.program_id(1)

    @pl.when(k == 0)
    def _():
        o_ref[...] = jnp.zeros_like(o_ref)

    # Linear transform for this column block of (pre-scaled) source nodes.
    xw = jnp.dot(x_ref[...], wt_ref[...],
                 preferred_element_type=jnp.float32)            # [TK, Fpad]

    # Dominant aggregation matmul: bf16 x bf16 -> f32 accumulation on the MXU.
    o_ref[...] += jnp.dot(a_ref[...], xw.astype(jnp.bfloat16),
                          preferred_element_type=jnp.float32)

    @pl.when(k == pl.num_programs(1) - 1)
    def _():
        # Target-side D^{-1/2} row scaling; bias added in the wrapper.
        o_ref[...] = o_ref[...] * dinv_row_ref[...]


def gcn_conv_pallas(x, edge_index, weight, bias, *, tm=512, tk=512):
    """x: [N, Fin] f32, edge_index: [2, E] int32, weight: [Fout, Fin], bias: [Fout]."""
    n, f_in = x.shape
    f_out = weight.shape[0]
    f_pad = max(128, pl.cdiv(f_out, 128) * 128)   # lane-dense output width

    # Clamp tiles to the 256-aligned padded node count so tiny graphs use a
    # 1x1 grid; multiples of 256 fill the 256x256 MXU on v6e/v7x.
    n256 = pl.cdiv(n, 256) * 256
    tm = min(tm, n256)
    tk = min(tk, n256)

    n_r = pl.cdiv(n, tm) * tm
    n_c = pl.cdiv(n, tk) * tk

    src = edge_index[0]
    dst = edge_index[1]

    # --- O(E) glue: degrees including self-loops, straight from edge_index ---
    deg = jnp.ones((n,), jnp.float32).at[dst].add(1.0)          # >= 1 always
    dinv = 1.0 / jnp.sqrt(deg)                                  # [N]

    # --- single-pass padded bf16 A_hat: append self-loop edges, one scatter ---
    idx = jnp.arange(n, dtype=edge_index.dtype)
    dst_all = jnp.concatenate([dst, idx])
    src_all = jnp.concatenate([src, idx])
    adj_p = (jnp.zeros((n_r, n_c), jnp.float32)
             .at[dst_all, src_all].add(1.0)
             .astype(jnp.bfloat16))                             # 0/1/2 exact

    # Pre-scale features by the source-side D^{-1/2} (commutes with X @ W^T).
    x_scaled = x.astype(jnp.float32) * dinv[:, None]
    x_p = jnp.zeros((n_c, f_in), jnp.float32).at[:n, :].set(x_scaled)
    dinv_r = jnp.zeros((n_r, 1), jnp.float32).at[:n, 0].set(dinv)
    wt_p = jnp.zeros((f_in, f_pad), jnp.float32).at[:, :f_out].set(
        weight.T.astype(jnp.float32))

    grid = (n_r // tm, n_c // tk)

    # Working set: double-buffered bf16 adjacency tile dominates; cap at 48 MiB
    # so it stays inside v7x's 64 MiB VMEM while still raising v5e's 16 MiB
    # default scoped limit.
    vmem_bytes = (2 * tm * tk * 2            # adjacency (bf16, double-buffered)
                  + 2 * tk * f_in * 4        # x tiles
                  + 2 * tm * 4               # dinv rows
                  + f_in * f_pad * 4         # W^T (resident)
                  + 2 * tm * f_pad * 4)      # output tile + writeback buffer
    vmem_limit = min(48 * 1024 * 1024, vmem_bytes * 2 + (4 << 20))

    out = pl.pallas_call(
        gcn_kernel,
        out_shape=jax.ShapeDtypeStruct((n_r, f_pad), jnp.float32),
        grid_spec=pltpu.PrefetchScalarGridSpec(
            num_scalar_prefetch=0,
            grid=grid,
            in_specs=[
                pl.BlockSpec((tm, 1), lambda i, k: (i, 0)),        # dinv (targets)
                pl.BlockSpec((tm, tk), lambda i, k: (i, k)),       # A_hat tile
                pl.BlockSpec((tk, f_in), lambda i, k: (k, 0)),     # scaled X tile
                pl.BlockSpec((f_in, f_pad), lambda i, k: (0, 0)),  # W^T (resident)
            ],
            out_specs=pl.BlockSpec((tm, f_pad), lambda i, k: (i, 0)),
        ),
        compiler_params=pltpu.CompilerParams(
            # Row tiles independent -> megacore-shardable; column axis is the
            # reduction the resident output accumulates over.
            dimension_semantics=("parallel", "arbitrary"),
            vmem_limit_bytes=int(vmem_limit),
        ),
    )(dinv_r, adj_p, x_p, wt_p)

    return out[:n, :f_out] + bias[None, :].astype(jnp.float32)


def gcn_conv_reference(x, edge_index, weight, bias):
    """Pure-JAX f32 reference of the same math."""
    n = x.shape[0]
    src, dst = edge_index[0], edge_index[1]
    adj = jnp.zeros((n, n), jnp.float32).at[dst, src].add(1.0)
    adj = adj + jnp.eye(n, dtype=jnp.float32)
    deg = adj.sum(axis=1, keepdims=True)
    dinv = 1.0 / jnp.sqrt(deg)
    a_norm = adj * dinv * dinv.T
    return a_norm @ (x @ weight.T) + bias[None, :]


if __name__ == "__main__":
    key = jax.random.PRNGKey(0)
    k_x, k_w, k_b = jax.random.split(key, 3)

    # Small but multi-tile: 512 nodes with 256-wide tiles -> 2x2 grid,
    # exercising both the parallel row axis and the k-accumulation.
    N, F_IN, F_OUT = 512, 3, 2

    # Deterministic parameters (GCNConv(3, 2): weight [2, 3], bias [2]).
    weight = jax.random.normal(k_w, (F_OUT, F_IN), dtype=jnp.float32) * 0.5
    bias = jax.random.normal(k_b, (F_OUT,), dtype=jnp.float32) * 0.1

    # Deterministic inputs: node features + an undirected ring (duplicate-free).
    x = jax.random.normal(k_x, (N, F_IN), dtype=jnp.float32)
    idx = jnp.arange(N, dtype=jnp.int32)
    src = jnp.concatenate([idx, (idx + 1) % N])
    dst = jnp.concatenate([(idx + 1) % N, idx])
    edge_index = jnp.stack([src, dst]).astype(jnp.int32)   # [2, 2N]

    out = gcn_conv_pallas(x, edge_index, weight, bias, tm=256, tk=256)
    out = jax.block_until_ready(out)

    ref = gcn_conv_reference(x, edge_index, weight, bias)
    assert out.shape == (N, F_OUT)
    # xw is rounded to bf16 for the MXU aggregation -> relaxed tolerance.
    assert jnp.allclose(out, ref, atol=3e-2, rtol=3e-2), float(
        jnp.max(jnp.abs(out - ref)))

    print("KERNEL_OK")
</pallas_src>

<mosaic_0001>
module attributes {stable_mosaic.version = 11 : i64} {
  func.func @gcn_kernel(%arg0: i32, %arg1: i32, %arg2: memref<256x1xf32, #tpu.memory_space<vmem>>, %arg3: memref<256x256xbf16, #tpu.memory_space<vmem>>, %arg4: memref<256x3xf32, #tpu.memory_space<vmem>>, %arg5: memref<3x128xf32, #tpu.memory_space<vmem>>, %arg6: memref<256x128xf32, #tpu.memory_space<vmem>>) attributes {dimension_semantics = [#tpu.dimension_semantics<parallel>, #tpu.dimension_semantics<arbitrary>], iteration_bounds = array<i64: 2, 2>, scalar_prefetch = 0 : i64, scratch_operands = 0 : i64, tpu.core_type = #tpu.core_type<tc>, window_params = [{transform_indices = @transform_0, window_bounds = array<i64: 256, 1>}, {transform_indices = @transform_1, window_bounds = array<i64: 256, 256>}, {transform_indices = @transform_2, window_bounds = array<i64: 256, 3>}, {pipeline_mode = #tpu.pipeline_mode<synchronous>, transform_indices = @transform_3, window_bounds = array<i64: 3, 128>}, {transform_indices = @transform_4, window_bounds = array<i64: 256, 128>}]} {
    %c0_i32 = arith.constant 0 : i32
    %0 = arith.cmpi eq, %arg1, %c0_i32 : i32
    %1 = arith.extui %0 : i1 to i32
    %c0_i32_0 = arith.constant 0 : i32
    %2 = arith.cmpi ne, %1, %c0_i32_0 : i32
    scf.if %2 {
      %cst_12 = arith.constant 0.000000e+00 : f32
      %15 = vector.broadcast %cst_12 : f32 to vector<256x128xf32>
      %c0_13 = arith.constant 0 : index
      %c0_14 = arith.constant 0 : index
      %16 = vector.load %arg6[%c0_13, %c0_14] : memref<256x128xf32, #tpu.memory_space<vmem>>, vector<256x128xf32>
      tpu.vector_store %arg6[%c0_13, %c0_14], %15 {strides = array<i32>} : memref<256x128xf32, #tpu.memory_space<vmem>>, vector<256x128xf32>,
    } else {
    }
    %c0 = arith.constant 0 : index
    %c0_1 = arith.constant 0 : index
    %3 = vector.load %arg4[%c0, %c0_1] : memref<256x3xf32, #tpu.memory_space<vmem>>, vector<256x3xf32>
    %c0_2 = arith.constant 0 : index
    %c0_3 = arith.constant 0 : index
    %4 = vector.load %arg5[%c0_2, %c0_3] : memref<3x128xf32, #tpu.memory_space<vmem>>, vector<3x128xf32>
    %cst = arith.constant dense<0.000000e+00> : vector<256x128xf32>
    %5 = tpu.matmul %3, %4, %cst {dimension_numbers = #tpu.dot_dimension_numbers<[1], [0], [0], [1], [0, 0, 1, 1], [], []>} : vector<256x3xf32>, vector<3x128xf32>, vector<256x128xf32> -> vector<256x128xf32>
    %c0_4 = arith.constant 0 : index
    %c0_5 = arith.constant 0 : index
    %6 = vector.load %arg6[%c0_4, %c0_5] : memref<256x128xf32, #tpu.memory_space<vmem>>, vector<256x128xf32>
    %c0_6 = arith.constant 0 : index
    %c0_7 = arith.constant 0 : index
    %7 = vector.load %arg3[%c0_6, %c0_7] : memref<256x256xbf16, #tpu.memory_space<vmem>>, vector<256x256xbf16>
    %8 = arith.truncf %5 : vector<256x128xf32> to vector<256x128xbf16>
    %cst_8 = arith.constant dense<0.000000e+00> : vector<256x128xf32>
    %9 = tpu.matmul %7, %8, %cst_8 {dimension_numbers = #tpu.dot_dimension_numbers<[1], [0], [0], [1], [0, 0, 1, 1], [], []>} : vector<256x256xbf16>, vector<256x128xbf16>, vector<256x128xf32> -> vector<256x128xf32>
    %10 = arith.addf %6, %9 : vector<256x128xf32>
    %c0_9 = arith.constant 0 : index
    %c0_10 = arith.constant 0 : index
    %11 = vector.load %arg6[%c0_9, %c0_10] : memref<256x128xf32, #tpu.memory_space<vmem>>, vector<256x128xf32>
    tpu.vector_store %arg6[%c0_9, %c0_10], %10 {strides = array<i32>} : memref<256x128xf32, #tpu.memory_space<vmem>>, vector<256x128xf32>,
    %c1_i32 = arith.constant 1 : i32
    %12 = arith.cmpi eq, %arg1, %c1_i32 : i32
    %13 = arith.extui %12 : i1 to i32
    %c0_i32_11 = arith.constant 0 : i32
    %14 = arith.cmpi ne, %13, %c0_i32_11 : i32
    scf.if %14 {
      %c0_12 = arith.constant 0 : index
      %c0_13 = arith.constant 0 : index
      %15 = vector.load %arg6[%c0_12, %c0_13] : memref<256x128xf32, #tpu.memory_space<vmem>>, vector<256x128xf32>
      %c0_14 = arith.constant 0 : index
      %c0_15 = arith.constant 0 : index
      %16 = vector.load %arg2[%c0_14, %c0_15] : memref<256x1xf32, #tpu.memory_space<vmem>>, vector<256x1xf32>
      %17 = vector.broadcast %16 : vector<256x1xf32> to vector<256x128xf32>
      %18 = arith.mulf %15, %17 : vector<256x128xf32>
      %c0_16 = arith.constant 0 : index
      %c0_17 = arith.constant 0 : index
      %19 = vector.load %arg6[%c0_16, %c0_17] : memref<256x128xf32, #tpu.memory_space<vmem>>, vector<256x128xf32>
      tpu.vector_store %arg6[%c0_16, %c0_17], %18 {strides = array<i32>} : memref<256x128xf32, #tpu.memory_space<vmem>>, vector<256x128xf32>,
    } else {
    }
    return
  }
  func.func @transform_0(%arg0: i32, %arg1: i32) -> (i32, i32) {
    %c0_i32 = arith.constant 0 : i32
    %c0_i32_0 = arith.constant 0 : i32
    return %arg0, %c0_i32 : i32, i32
  }
  func.func @transform_1(%arg0: i32, %arg1: i32) -> (i32, i32) {
    %c0_i32 = arith.constant 0 : i32
    return %arg0, %arg1 : i32, i32
  }
  func.func @transform_2(%arg0: i32, %arg1: i32) -> (i32, i32) {
    %c0_i32 = arith.constant 0 : i32
    %c0_i32_0 = arith.constant 0 : i32
    return %arg1, %c0_i32 : i32, i32
  }
  func.func @transform_3(%arg0: i32, %arg1: i32) -> (i32, i32) {
    %c0_i32 = arith.constant 0 : i32
    %c0_i32_0 = arith.constant 0 : i32
    %c0_i32_1 = arith.constant 0 : i32
    return %c0_i32, %c0_i32_0 : i32, i32
  }
  func.func @transform_4(%arg0: i32, %arg1: i32) -> (i32, i32) {
    %c0_i32 = arith.constant 0 : i32
    %c0_i32_0 = arith.constant 0 : i32
    return %arg0, %c0_i32 : i32, i32
  }
}

</mosaic_0001>

<bundles_post_ra>
// kernel: tpu_custom_call.1
= control target key start
LH: loop header
LB: loop body
LE: loop exit
PB: predicated region body
PF: predicated region fallthrough
CT: control target
= control target key end

     0   :  { %s2827_s0 = inlined_call_operand.vmem [shape: f32[512,1], index: 0, kind: input, shape index: {}]   ;;  %s2828_s1 = inlined_call_operand.vmem [shape: bf16[512,512], index: 1, kind: input, shape index: {}]   ;;  %s2829_s2 = inlined_call_operand.vmem [shape: f32[512,3], index: 2, kind: input, shape index: {}]   ;;  %s2830_s3 = inlined_call_operand.vmem [shape: f32[3,128], index: 3, kind: input, shape index: {}]   ;;  %s2831_s4 = inlined_call_operand.hbm [shape: f32[512,128], index: 4, kind: output, shape index: {}]  }
   0x1   :  { %2835 = sst [smem:[#allocation8_spill]] %s2828_s1 }
   0x2   :  { %9 = vsyncpa [#allocation4], 0 }
   0x3   :  { %11 = vsyncpa [#allocation4 + $0x1], 0  ;;  %s2276_s15 = smov 0   ;;  %s2278_s16 = smov 0  }
   0x4   :  { %s2280_s17 = smov 0   ;;  %s2282_s18 = smov 0  }
   0x5   :  { %s2284_s19 = smov 0   ;;  %s2286_s20 = smov 0  }
   0x6   :  { %s2288_s21 = smov 0   ;;  %s2290_s22 = smov 0  }
   0x7   :  { %s2292_s23 = smov 0   ;;  %s2294_s24 = smov 0  }
   0x8 LB: > { %s1692_s25 = sadd.s32 4294967295, %s2244_s24   ;;  %s1693_s26 = sadd.s32 4294967294, %s2244_s24   ;;  %s2244_s24 = sphi %s2294_s24, %s17_s24   ;;  %s2240_s23 = sphi %s2292_s23, %s2853_s23   ;;  %s2236_s22 = sphi %s2290_s22, %s2852_s22   ;;  %s2232_s21 = sphi %s2288_s21, %s2851_s21   ;;  %s2228_s20 = sphi %s2286_s20, %s2850_s20   ;;  %s2224_s19 = sphi %s2284_s19, %s2849_s19   ;;  %s2220_s18 = sphi %s2282_s18, %s2848_s18   ;;  %s2216_s17 = sphi %s2280_s17, %s2847_s17   ;;  %s2212_s16 = sphi %s2278_s16, %s2846_s16   ;;  %s2208_s15 = sphi %s2276_s15, %s2845_s15  }
   0x9   : > { %s26_s27 = sadd.s32 1, %s2236_s22  ;;  %s29_s28 = sadd.s32 1, %s2240_s23 }
   0xa   : > { %p27_p0 = scmp.ge.s32.totalorder %s26_s27, 2  ;;  %s64_s29 = sadd.s32 1, %s2224_s19 }
   0xb   : > { %p71_p1 = scmp.ne.s32.totalorder %s2224_s19, %s2220_s18  ;;  %p72_p2 = scmp.eq.s32.totalorder %s2244_s24, 0 }
   0xc   : > { %s2855_s27 = smov (%p27_p0, %s26_s27), 0  ;;  %s2857_s28 = smov (!%p27_p0, %s29_s28), %s2240_s23 }
   0xd   : > { %2836 = sst [smem:[#allocation6_spill]] %s2855_s27  ;;  %s60_s30 = ssub.s32 %s2236_s22, %s2855_s27 }
   0xe   : > { %p2339_p3 = por %p72_p2, %p71_p1  ;;  %p31_p4 = scmp.ge.s32.totalorder %s2857_s28, 2 }
   0xf   : > { %s137_s6 = sadd.s32 1, %s2216_s17  ;;  %p147_p5 = scmp.ne.s32.totalorder %s2216_s17, %s2212_s16 }
  0x10   : > { %p148_p6 = scmp.eq.s32.totalorder %s1692_s25, 3  ;;  %s2859_s28 = smov (%p31_p4, %s2857_s28), 0 }
  0x11   : > { %2838 = sst [smem:[#allocation7_spill]] %s2859_s28  ;;  %p153_p8 = scmp.ne.s32.totalorder %s2212_s16, %s2208_s15 }
  0x12   : > { %p2348_p7 = por %p148_p6, %p147_p5  ;;  %s59_s8 = ssub.s32 %s2240_s23, %s2859_s28 }
  0x13   : > { %p154_p9 = scmp.eq.s32.totalorder %s1693_s26, 3  ;;  %s61_s9 = sor.u32 %s60_s30, %s59_s8 }
  0x14   : > { %p135_p10 = scmp.eq.s32.totalorder %s59_s8, 0  ;;  %p62_p11 = scmp.eq.s32.totalorder %s61_s9, 0 }
  0x15   : > { %p2356_p12 = por %p154_p9, %p153_p8  ;;  %p1695_p13 = scmp.ge.s32.totalorder %s2244_s24, 4 }
  0x16   : > { %s2361_s11 = scalar_select %p135_p10, %s2216_s17, %s137_s6  }
  0x17   : > { %s2364_s12 = scalar_select %p62_p11, %s2224_s19, %s64_s29  }
  0x18   : > { %173 = sbr.rel (%p1695_p13) target bundleno = 57 (0x39), region = 20 }
  0x1f   : > { %185 = sbr.rel (!%p2339_p3) target bundleno = 57 (0x39), region = 28  ;;  %s187_s13 = sand.u32 (%p2339_p3), 1, %s2224_s19  }
  0x20   : > { %s1698_s14 = sshll.u32 (%p2339_p3), %s2236_s22, 1  ;;  %s1696_s25 = sshll.u32 (%p2339_p3), %s187_s13, 8 }
  0x21   : > { %s1780_s26 = sshll.u32 (%p2339_p3), %s2240_s23, 7  ;;  %s2841_s1 = sld [smem:[#allocation8_spill]] (%p2339_p3) }
  0x22   : > { %s193_s30 = sadd.s32 (%p2339_p3), %s1780_s26, %s1698_s14  ;;  %s2380_s5 = scalar_lea.vmem (%p2339_p3), [#allocation2], %s1696_s25 }
  0x23   : > { %s1700_s8 = sshll.u32 (%p2339_p3), %s193_s30, 2 }
  0x27   : > { %s2375_s29 = scalar_lea.vmem %s2841_s1, %s1700_s8 }
  0x28   : > { %v285_v0 = vld [vmem:[%s2375_s29] sm:$0xff]  ;;  %v287_v1 = vld [vmem:[%s2375_s29 + $0x10] sm:$0xff] }
  0x29   : > { %v289_v2 = vld [vmem:[%s2375_s29 + $0x20] sm:$0xff]  ;;  %286 = vst [vmem:[%s2380_s5] sm:$0xff] %v285_v0  ;;  %288 = vst [vmem:[%s2380_s5 + $0x8] sm:$0xff] %v287_v1  ;;  %v291_v3 = vld [vmem:[%s2375_s29 + $0x30] sm:$0xff] }
  0x2a   : > { %290 = vst [vmem:[%s2380_s5 + $0x10] sm:$0xff] %v289_v2  ;;  %v293_v4 = vld [vmem:[%s2375_s29 + $0x40] sm:$0xff]  ;;  %v295_v5 = vld [vmem:[%s2375_s29 + $0x50] sm:$0xff]  ;;  %292 = vst [vmem:[%s2380_s5 + $0x18] sm:$0xff] %v291_v3 }
  0x2b   : > { %294 = vst [vmem:[%s2380_s5 + $0x20] sm:$0xff] %v293_v4  ;;  %296 = vst [vmem:[%s2380_s5 + $0x28] sm:$0xff] %v295_v5  ;;  %v297_v6 = vld [vmem:[%s2375_s29 + $0x60] sm:$0xff]  ;;  %v299_v7 = vld [vmem:[%s2375_s29 + $0x70] sm:$0xff] }
  0x2c   : > { %v301_v8 = vld [vmem:[%s2375_s29 + $0x80] sm:$0xff]  ;;  %298 = vst [vmem:[%s2380_s5 + $0x30] sm:$0xff] %v297_v6  ;;  %300 = vst [vmem:[%s2380_s5 + $0x38] sm:$0xff] %v299_v7  ;;  %v303_v9 = vld [vmem:[%s2375_s29 + $0x90] sm:$0xff] }
  0x2d   : > { %302 = vst [vmem:[%s2380_s5 + $0x40] sm:$0xff] %v301_v8  ;;  %v305_v10 = vld [vmem:[%s2375_s29 + $0xa0] sm:$0xff]  ;;  %v307_v11 = vld [vmem:[%s2375_s29 + $0xb0] sm:$0xff]  ;;  %304 = vst [vmem:[%s2380_s5 + $0x48] sm:$0xff] %v303_v9 }
  0x2e   : > { %306 = vst [vmem:[%s2380_s5 + $0x50] sm:$0xff] %v305_v10  ;;  %308 = vst [vmem:[%s2380_s5 + $0x58] sm:$0xff] %v307_v11  ;;  %v309_v12 = vld [vmem:[%s2375_s29 + $0xc0] sm:$0xff]  ;;  %v311_v13 = vld [vmem:[%s2375_s29 + $0xd0] sm:$0xff] }
  0x2f   : > { %v313_v14 = vld [vmem:[%s2375_s29 + $0xe0] sm:$0xff]  ;;  %310 = vst [vmem:[%s2380_s5 + $0x60] sm:$0xff] %v309_v12  ;;  %312 = vst [vmem:[%s2380_s5 + $0x68] sm:$0xff] %v311_v13  ;;  %v315_v15 = vld [vmem:[%s2375_s29 + $0xf0] sm:$0xff] }
  0x30   : > { %314 = vst [vmem:[%s2380_s5 + $0x70] sm:$0xff] %v313_v14  ;;  %v317_v16 = vld [vmem:[%s2375_s29 + $0x100] sm:$0xff]  ;;  %v319_v17 = vld [vmem:[%s2375_s29 + $0x110] sm:$0xff]  ;;  %316 = vst [vmem:[%s2380_s5 + $0x78] sm:$0xff] %v315_v15 }
  0x31   : > { %318 = vst [vmem:[%s2380_s5 + $0x80] sm:$0xff] %v317_v16  ;;  %320 = vst [vmem:[%s2380_s5 + $0x88] sm:$0xff] %v319_v17  ;;  %v321_v18 = vld [vmem:[%s2375_s29 + $0x120] sm:$0xff]  ;;  %v323_v19 = vld [vmem:[%s2375_s29 + $0x130] sm:$0xff] }
  0x32   : > { %v325_v20 = vld [vmem:[%s2375_s29 + $0x140] sm:$0xff]  ;;  %322 = vst [vmem:[%s2380_s5 + $0x90] sm:$0xff] %v321_v18  ;;  %324 = vst [vmem:[%s2380_s5 + $0x98] sm:$0xff] %v323_v19  ;;  %v327_v21 = vld [vmem:[%s2375_s29 + $0x150] sm:$0xff] }
  0x33   : > { %326 = vst [vmem:[%s2380_s5 + $0xa0] sm:$0xff] %v325_v20  ;;  %v329_v22 = vld [vmem:[%s2375_s29 + $0x160] sm:$0xff]  ;;  %v331_v23 = vld [vmem:[%s2375_s29 + $0x170] sm:$0xff]  ;;  %328 = vst [vmem:[%s2380_s5 + $0xa8] sm:$0xff] %v327_v21 }
  0x34   : > { %330 = vst [vmem:[%s2380_s5 + $0xb0] sm:$0xff] %v329_v22  ;;  %332 = vst [vmem:[%s2380_s5 + $0xb8] sm:$0xff] %v331_v23  ;;  %v333_v24 = vld [vmem:[%s2375_s29 + $0x180] sm:$0xff]  ;;  %v335_v25 = vld [vmem:[%s2375_s29 + $0x190] sm:$0xff] }
  0x35   : > { %v337_v26 = vld [vmem:[%s2375_s29 + $0x1a0] sm:$0xff]  ;;  %334 = vst [vmem:[%s2380_s5 + $0xc0] sm:$0xff] %v333_v24  ;;  %336 = vst [vmem:[%s2380_s5 + $0xc8] sm:$0xff] %v335_v25  ;;  %v339_v27 = vld [vmem:[%s2375_s29 + $0x1b0] sm:$0xff] }
  0x36   : > { %338 = vst [vmem:[%s2380_s5 + $0xd0] sm:$0xff] %v337_v26  ;;  %v341_v28 = vld [vmem:[%s2375_s29 + $0x1c0] sm:$0xff]  ;;  %v343_v29 = vld [vmem:[%s2375_s29 + $0x1d0] sm:$0xff]  ;;  %340 = vst [vmem:[%s2380_s5 + $0xd8] sm:$0xff] %v339_v27 }
  0x37   : > { %342 = vst [vmem:[%s2380_s5 + $0xe0] sm:$0xff] %v341_v28  ;;  %344 = vst [vmem:[%s2380_s5 + $0xe8] sm:$0xff] %v343_v29  ;;  %v345_v30 = vld [vmem:[%s2375_s29 + $0x1e0] sm:$0xff]  ;;  %v347_v31 = vld [vmem:[%s2375_s29 + $0x1f0] sm:$0xff] }
  0x38   : > { %346 = vst [vmem:[%s2380_s5 + $0xf0] sm:$0xff] %v345_v30  ;;  %348 = vst [vmem:[%s2380_s5 + $0xf8] sm:$0xff] %v347_v31 }
  0x39 PF: > { %p1701_p0 = scmp.ge.s32.totalorder %s2244_s24, 1  ;;  %p362_p1 = scmp.lt.s32.totalorder %s2244_s24, 5 }
  0x3b   : > { %p363_p2 = pnand %p1701_p0, %p362_p1 }
  0x3c   : > { %s369_s13 = sand.u32 (!%p363_p2), 1, %s2220_s18   ;;  %s2834_s14 = sand.u32 (!%p363_p2), 1, %s2212_s16  }
  0x3d   : > { %366 = sbr.rel (%p363_p2) target bundleno = 838 (0x346), region = 70  ;;  %s1702_s25 = sshll.u32 (!%p363_p2), %s369_s13, 8 }
  0x3e   : > { %s1703_s26 = sshll.u32 (!%p363_p2), %s2834_s14, 8  ;;  %s1704_s30 = sshll.u32 (!%p363_p2), %s2232_s21, 5 }
  0x3f   : > { %s1706_s8 = sshll.u32 (!%p363_p2), %s2228_s20, 5  ;;  %p405_p3 = scmp.lt.s32.totalorder (!%p363_p2), %s1704_s30, 63 }
  0x40   : > { %p413_p4 = scmp.lt.s32.totalorder (!%p363_p2), %s1706_s8, 63  ;;  %s2461_s13 = scalar_lea.vmem (!%p363_p2), [#allocation2], %s1702_s25 }
  0x41   : > { %s2463_s14 = scalar_lea.vmem (!%p363_p2), [#allocation3], %s1703_s26  ;;  %p1708_p5 = scmp.ne.s32.totalorder (!%p363_p2), %s2228_s20, 0 }
  0x44   : > { %s2861_s30 = smov (!%p405_p3, %s1704_s30), 63  ;;  %s2863_s8 = smov (!%p413_p4, %s1706_s8), 63 }
  0x45   : > { %s1705_s9 = sshll.u32 %s2861_s30, 3  ;;  %s1707_s1 = sshll.u32 %s2863_s8, 3  ;;  %v2246_v32 = vmov (!%p1708_p5), 0.0  }
  0x46   : > { %s2454_s5 = scalar_lea.vmem %s2827_s0, %s1705_s9  ;;  %s2459_s18 = scalar_lea.vmem %s2829_s2, %s1707_s1  ;;  %424 = vst [vmem:[%s2463_s14] sm:$0xff] (!%p1708_p5), %v2246_v32  ;;  %425 = vst [vmem:[%s2463_s14 + $0x8] sm:$0xff] (!%p1708_p5), %v2246_v32 }
  0x47   : > { %423 = sbr.rel (%p1708_p5) target bundleno = 86 (0x56), region = 78  ;;  %426 = vst [vmem:[%s2463_s14 + $0x10] sm:$0xff] (!%p1708_p5), %v2246_v32  ;;  %427 = vst [vmem:[%s2463_s14 + $0x18] sm:$0xff] (!%p1708_p5), %v2246_v32 }
  0x48   : > { %428 = vst [vmem:[%s2463_s14 + $0x20] sm:$0xff] (!%p1708_p5), %v2246_v32  ;;  %429 = vst [vmem:[%s2463_s14 + $0x28] sm:$0xff] (!%p1708_p5), %v2246_v32 }
  0x49   : > { %430 = vst [vmem:[%s2463_s14 + $0x30] sm:$0xff] (!%p1708_p5), %v2246_v32  ;;  %431 = vst [vmem:[%s2463_s14 + $0x38] sm:$0xff] (!%p1708_p5), %v2246_v32 }
  0x4a   : > { %432 = vst [vmem:[%s2463_s14 + $0x40] sm:$0xff] (!%p1708_p5), %v2246_v32  ;;  %433 = vst [vmem:[%s2463_s14 + $0x48] sm:$0xff] (!%p1708_p5), %v2246_v32 }
  0x4b   : > { %434 = vst [vmem:[%s2463_s14 + $0x50] sm:$0xff] (!%p1708_p5), %v2246_v32  ;;  %435 = vst [vmem:[%s2463_s14 + $0x58] sm:$0xff] (!%p1708_p5), %v2246_v32 }
  0x4c   : > { %436 = vst [vmem:[%s2463_s14 + $0x60] sm:$0xff] (!%p1708_p5), %v2246_v32  ;;  %437 = vst [vmem:[%s2463_s14 + $0x68] sm:$0xff] (!%p1708_p5), %v2246_v32 }
  0x4d   : > { %438 = vst [vmem:[%s2463_s14 + $0x70] sm:$0xff] (!%p1708_p5), %v2246_v32  ;;  %439 = vst [vmem:[%s2463_s14 + $0x78] sm:$0xff] (!%p1708_p5), %v2246_v32 }
  0x4e   : > { %440 = vst [vmem:[%s2463_s14 + $0x80] sm:$0xff] %v2246_v32  ;;  %441 = vst [vmem:[%s2463_s14 + $0x88] sm:$0xff] %v2246_v32 }
  0x4f   : > { %442 = vst [vmem:[%s2463_s14 + $0x90] sm:$0xff] %v2246_v32  ;;  %443 = vst [vmem:[%s2463_s14 + $0x98] sm:$0xff] %v2246_v32 }
  0x50   : > { %444 = vst [vmem:[%s2463_s14 + $0xa0] sm:$0xff] %v2246_v32  ;;  %445 = vst [vmem:[%s2463_s14 + $0xa8] sm:$0xff] %v2246_v32 }
  0x51   : > { %446 = vst [vmem:[%s2463_s14 + $0xb0] sm:$0xff] %v2246_v32  ;;  %447 = vst [vmem:[%s2463_s14 + $0xb8] sm:$0xff] %v2246_v32 }
  0x52   : > { %448 = vst [vmem:[%s2463_s14 + $0xc0] sm:$0xff] %v2246_v32  ;;  %449 = vst [vmem:[%s2463_s14 + $0xc8] sm:$0xff] %v2246_v32 }
  0x53   : > { %450 = vst [vmem:[%s2463_s14 + $0xd0] sm:$0xff] %v2246_v32  ;;  %451 = vst [vmem:[%s2463_s14 + $0xd8] sm:$0xff] %v2246_v32 }
  0x54   : > { %452 = vst [vmem:[%s2463_s14 + $0xe0] sm:$0xff] %v2246_v32  ;;  %453 = vst [vmem:[%s2463_s14 + $0xe8] sm:$0xff] %v2246_v32 }
  0x55   : > { %454 = vst [vmem:[%s2463_s14 + $0xf0] sm:$0xff] %v2246_v32  ;;  %455 = vst [vmem:[%s2463_s14 + $0xf8] sm:$0xff] %v2246_v32 }
  0x56 PF: > { %v488_v33 = vld [vmem:[%s2830_s3] sm:$0x7]  ;;  %vm586_vm0 = vcmask 1042432   ;;  %vm489_vm1 = vcmask 23552   ;;  %v457_v35 = vld [vmem:[%s2459_s18 + $0x8] sm:$0xff]  ;;  %v458_v36 = vld [vmem:[%s2459_s18 + $0x10] sm:$0xff] }
  0x57   : > { %v456_v34 = vld [vmem:[%s2459_s18] sm:$0xff]  ;;  %1927 = vmatprep.subr.msk.mxu0 %vm586_vm0, %v488_v33  ;;  %v459_v37 = vld [vmem:[%s2459_s18 + $0x18] sm:$0xff]  ;;  %v461_v39 = vld [vmem:[%s2459_s18 + $0x28] sm:$0xff]  ;;  %p1774_p6 = scmp.ne.s32.totalorder %s2228_s20, 1 }
  0x58   : > { %1929 = vmatprep.mubr.msk.f32.mxu0 %vm489_vm1, %v456_v34  ;;  %1928 = vmatpush3.msk.msra.mxu0 %vm586_vm0, %v488_v33  ;;  %v460_v38 = vld [vmem:[%s2459_s18 + $0x20] sm:$0xff]  ;;  %v462_v40 = vld [vmem:[%s2459_s18 + $0x30] sm:$0xff]  ;;  %v463_v41 = vld [vmem:[%s2459_s18 + $0x38] sm:$0xff] }
  0x59   : > { %1930 = vmatmul.mubr.msk.f32.vlgmr.msra.gmra.mrb[0].mxu0 %vm489_vm1, %v457_v35  ;;  %v464_v42 = vld [vmem:[%s2459_s18 + $0x40] sm:$0xff]  ;;  %v465_v43 = vld [vmem:[%s2459_s18 + $0x48] sm:$0xff]  ;;  %v466_v44 = vld [vmem:[%s2459_s18 + $0x50] sm:$0xff] }
  0x5a   : > { %1932 = vmatprep.mubr.msk.f32.mxu0 %vm489_vm1, %v458_v36  ;;  %v467_v45 = vld [vmem:[%s2459_s18 + $0x58] sm:$0xff]  ;;  %v468_v46 = vld [vmem:[%s2459_s18 + $0x60] sm:$0xff]  ;;  %v469_v47 = vld [vmem:[%s2459_s18 + $0x68] sm:$0xff] }
  0x5b   : > { %v470_v48 = vld [vmem:[%s2459_s18 + $0x70] sm:$0xff]  ;;  %v471_v49 = vld [vmem:[%s2459_s18 + $0x78] sm:$0xff]  ;;  %v472_v50 = vld [vmem:[%s2459_s18 + $0x80] sm:$0xff] }
  0x5c   : > { %v473_v51 = vld [vmem:[%s2459_s18 + $0x88] sm:$0xff]  ;;  %v474_v52 = vld [vmem:[%s2459_s18 + $0x90] sm:$0xff]  ;;  %v475_v53 = vld [vmem:[%s2459_s18 + $0x98] sm:$0xff] }
  0x5d   : > { %1933 = vmatmul.mubr.msk.f32.gmra.mrb[2].mxu0 %vm489_vm1, %v459_v37  ;;  %v476_v54 = vld [vmem:[%s2459_s18 + $0xa0] sm:$0xff]  ;;  %v477_v55 = vld [vmem:[%s2459_s18 + $0xa8] sm:$0xff]  ;;  %v478_v56 = vld [vmem:[%s2459_s18 + $0xb0] sm:$0xff] }
  0x5e   : > { %1935 = vmatprep.mubr.msk.f32.mxu0 %vm489_vm1, %v460_v38  ;;  %v479_v57 = vld [vmem:[%s2459_s18 + $0xb8] sm:$0xff]  ;;  %v480_v58 = vld [vmem:[%s2459_s18 + $0xc0] sm:$0xff]  ;;  %v481_v59 = vld [vmem:[%s2459_s18 + $0xc8] sm:$0xff] }
  0x5f   : > { %v482_v60 = vld [vmem:[%s2459_s18 + $0xd0] sm:$0xff]  ;;  %v483_v61 = vld [vmem:[%s2459_s18 + $0xd8] sm:$0xff]  ;;  %v484_v62 = vld [vmem:[%s2459_s18 + $0xe0] sm:$0xff] }
  0x60   : > { %v485_v63 = vld [vmem:[%s2459_s18 + $0xe8] sm:$0xff]  ;;  %v486_v0 = vld [vmem:[%s2459_s18 + $0xf0] sm:$0xff]  ;;  %v487_v1 = vld [vmem:[%s2459_s18 + $0xf8] sm:$0xff] }
  0x61   : > { %1936 = vmatmul.mubr.msk.f32.gmra.mrb[4].mxu0 %vm489_vm1, %v461_v39  ;;  %v2086_v2 = vld [vmem:[%s2461_s13 + $0x54] ss:$8 sps:$4 sm:$0xff]   ;;  %v2104_v3 = vld [vmem:[%s2461_s13 + $0x4] ss:$8 sps:$4 sm:$0xff]  }
  0x62   : > { %1938 = vmatprep.mubr.msk.f32.mxu0 %vm489_vm1, %v462_v40  ;;  %1127 = vmatprep.mubr.bf16.mxu1 %v2086_v2  ;;  %v2096_v2 = vld [vmem:[%s2461_s13 + $0x94] ss:$8 sps:$4 sm:$0xff]  }
  0x65   : > { %1939 = vmatmul.mubr.msk.f32.gmra.mrb[6].mxu0 %vm489_vm1, %v463_v41 }
  0x66   : > { %1941 = vmatprep.mubr.msk.f32.mxu0 %vm489_vm1, %v464_v42 }
  0x69   : > { %1942 = vmatmul.mubr.msk.f32.gmra.mrb[8].mxu0 %vm489_vm1, %v465_v43 }
  0x6a   : > { %1944 = vmatprep.mubr.msk.f32.mxu0 %vm489_vm1, %v466_v44 }
  0x6d   : > { %1945 = vmatmul.mubr.msk.f32.gmra.mrb[10].mxu0 %vm489_vm1, %v467_v45 }
  0x6e   : > { %1947 = vmatprep.mubr.msk.f32.mxu0 %vm489_vm1, %v468_v46 }
  0x71   : > { %1948 = vmatmul.mubr.msk.f32.gmra.mrb[12].mxu0 %vm489_vm1, %v469_v47 }
  0x72   : > { %1950 = vmatprep.mubr.msk.f32.mxu0 %vm489_vm1, %v470_v48 }
  0x75   : > { %1951 = vmatmul.mubr.msk.f32.gmra.mrb[14].mxu0 %vm489_vm1, %v471_v49 }
  0x76   : > { %1953 = vmatprep.mubr.msk.f32.mxu0 %vm489_vm1, %v472_v50 }
  0x79   : > { %1954 = vmatmul.mubr.msk.f32.gmra.mrb[16].mxu0 %vm489_vm1, %v473_v51 }
  0x7a   : > { %1956 = vmatprep.mubr.msk.f32.mxu0 %vm489_vm1, %v474_v52  ;;  %v2084_v52 = vld [vmem:[%s2461_s13 + $0x50] ss:$8 sps:$4 sm:$0xff]  }
  0x7d   : > { %1957 = vmatmul.mubr.msk.f32.gmra.mrb[18].mxu0 %vm489_vm1, %v475_v53  ;;  %v2102_v53 = vld [vmem:[%s2461_s13] ss:$8 sps:$4 sm:$0xff]  }
  0x7e   : > { %1959 = vmatprep.mubr.msk.f32.mxu0 %vm489_vm1, %v476_v54  ;;  %v2087_v54 = vld [vmem:[%s2461_s13 + $0x64] ss:$8 sps:$4 sm:$0xff]  }
  0x81   : > { %1960 = vmatmul.mubr.msk.f32.gmra.mrb[20].mxu0 %vm489_vm1, %v477_v55  ;;  %v2108_v55 = vld [vmem:[%s2461_s13 + $0x14] ss:$8 sps:$4 sm:$0xff]  }
  0x82   : > { %1962 = vmatprep.mubr.msk.f32.mxu0 %vm489_vm1, %v478_v56  ;;  %v2089_v56 = vld [vmem:[%s2461_s13 + $0x60] ss:$8 sps:$4 sm:$0xff]  }
  0x85   : > { %1963 = vmatmul.mubr.msk.f32.gmra.mrb[22].mxu0 %vm489_vm1, %v479_v57  ;;  %v2110_v57 = vld [vmem:[%s2461_s13 + $0x10] ss:$8 sps:$4 sm:$0xff]  }
  0x86   : > { %1965 = vmatprep.mubr.msk.f32.mxu0 %vm489_vm1, %v480_v58  ;;  %v2090_v58 = vld [vmem:[%s2461_s13 + $0x74] ss:$8 sps:$4 sm:$0xff]  }
  0x89   : > { %1966 = vmatmul.mubr.msk.f32.gmra.mrb[24].mxu0 %vm489_vm1, %v481_v59  ;;  %v2114_v59 = vld [vmem:[%s2461_s13 + $0x24] ss:$8 sps:$4 sm:$0xff]  }
  0x8a   : > { %1968 = vmatprep.mubr.msk.f32.mxu0 %vm489_vm1, %v482_v60  ;;  %v2092_v60 = vld [vmem:[%s2461_s13 + $0x70] ss:$8 sps:$4 sm:$0xff]  }
  0x8d   : > { %1969 = vmatmul.mubr.msk.f32.gmra.mrb[26].mxu0 %vm489_vm1, %v483_v61  ;;  %v2116_v61 = vld [vmem:[%s2461_s13 + $0x20] ss:$8 sps:$4 sm:$0xff]  }
  0x8e   : > { %1971 = vmatprep.mubr.msk.f32.mxu0 %vm489_vm1, %v484_v62  ;;  %v2093_v62 = vld [vmem:[%s2461_s13 + $0x84] ss:$8 sps:$4 sm:$0xff]  }
  0x91   : > { %1972 = vmatmul.mubr.msk.f32.gmra.mrb[28].mxu0 %vm489_vm1, %v485_v63  ;;  %v2120_v63 = vld [vmem:[%s2461_s13 + $0x34] ss:$8 sps:$4 sm:$0xff]  }
  0x92   : > { %1974 = vmatprep.mubr.msk.f32.mxu0 %vm489_vm1, %v486_v0  ;;  %v2095_v0 = vld [vmem:[%s2461_s13 + $0x80] ss:$8 sps:$4 sm:$0xff]  }
  0x95   : > { %1975 = vmatmul.mubr.msk.f32.gmra.mrb[30].mxu0 %vm489_vm1, %v487_v1  ;;  %v2122_v1 = vld [vmem:[%s2461_s13 + $0x30] ss:$8 sps:$4 sm:$0xff]  }
  0x96   : > { %1087 = vmatprep.mubr.bf16.mxu0 %v2104_v3  ;;  %v2126_v3 = vld [vmem:[%s2461_s13 + $0x44] ss:$8 sps:$4 sm:$0xff]  }
 0x12c   : > { %v1931_v4 = vpop.f32.mrb[0].mxu0 }
 0x12d   : > { %v656_v5 = vpop.f32.mrb[1].mxu0 }
 0x12e   : > { %v879_v6 = vpack.c.bf16 %v1931_v4, %v656_v5  ;;  %v2098_v4 = vld [vmem:[%s2461_s13 + $0x90] ss:$8 sps:$4 sm:$0xff]   ;;  %v2128_v5 = vld [vmem:[%s2461_s13 + $0x40] ss:$8 sps:$4 sm:$0xff]  }
 0x130   : > { %v1934_v7 = vpop.f32.mrb[2].mxu0 }
 0x131   : > { %v666_v8 = vpop.f32.mrb[3].mxu0 }
 0x132   : > { %v880_v9 = vpack.c.bf16 %v1934_v7, %v666_v8  ;;  %v2101_v7 = vld [vmem:[%s2461_s13 + $0xa0] ss:$8 sps:$4 sm:$0xff]   ;;  %v2105_v8 = vld [vmem:[%s2461_s13 + $0xb4] ss:$8 sps:$4 sm:$0xff]  }
 0x134   : > { %v1937_v10 = vpop.f32.mrb[4].mxu0 }
 0x135   : > { %v676_v11 = vpop.f32.mrb[5].mxu0 }
 0x136   : > { %v881_v12 = vpack.c.bf16 %v1937_v10, %v676_v11  ;;  %v2111_v10 = vld [vmem:[%s2461_s13 + $0xc4] ss:$8 sps:$4 sm:$0xff]   ;;  %v2113_v11 = vld [vmem:[%s2461_s13 + $0xc0] ss:$8 sps:$4 sm:$0xff]  }
 0x138   : > { %v1940_v13 = vpop.f32.mrb[6].mxu0 }
 0x139   : > { %v686_v14 = vpop.f32.mrb[7].mxu0 }
 0x13a   : > { %v882_v15 = vpack.c.bf16 %v1940_v13, %v686_v14  ;;  %v2119_v13 = vld [vmem:[%s2461_s13 + $0xd0] ss:$8 sps:$4 sm:$0xff]   ;;  %v2123_v14 = vld [vmem:[%s2461_s13 + $0xe4] ss:$8 sps:$4 sm:$0xff]  }
 0x13c   : > { %v1943_v16 = vpop.f32.mrb[8].mxu0 }
 0x13d   : > { %v696_v17 = vpop.f32.mrb[9].mxu0 }
 0x13e   : > { %v883_v18 = vpack.c.bf16 %v1943_v16, %v696_v17  ;;  %v2129_v16 = vld [vmem:[%s2461_s13 + $0xf4] ss:$8 sps:$4 sm:$0xff]   ;;  %v2131_v17 = vld [vmem:[%s2461_s13 + $0xf0] ss:$8 sps:$4 sm:$0xff]  }
 0x140   : > { %v1946_v19 = vpop.f32.mrb[10].mxu0 }
 0x141   : > { %v706_v20 = vpop.f32.mrb[11].mxu0 }
 0x142   : > { %v884_v21 = vpack.c.bf16 %v1946_v19, %v706_v20  ;;  %v825_v20 = vld [vmem:[%s2463_s14 + $0x50] sm:$0xff] }
 0x144   : > { %v1949_v22 = vpop.f32.mrb[12].mxu0 }
 0x145   : > { %v716_v23 = vpop.f32.mrb[13].mxu0 }
 0x146   : > { %v885_v24 = vpack.c.bf16 %v1949_v22, %v716_v23  ;;  %v815_v22 = vld [vmem:[%s2463_s14] sm:$0xff] }
 0x148   : > { %v1952_v25 = vpop.f32.mrb[14].mxu0 }
 0x149   : > { %v726_v26 = vpop.f32.mrb[15].mxu0 }
 0x14a   : > { %v886_v27 = vpack.c.bf16 %v1952_v25, %v726_v26 }
 0x14c   : > { %v1955_v28 = vpop.f32.mrb[16].mxu0 }
 0x14d   : > { %v736_v29 = vpop.f32.mrb[17].mxu0 }
 0x14e   : > { %v887_v30 = vpack.c.bf16 %v1955_v28, %v736_v29  ;;  %v826_v28 = vld [vmem:[%s2463_s14 + $0x58] sm:$0xff] }
 0x150   : > { %v1958_v31 = vpop.f32.mrb[18].mxu0  ;;  %1815 = vmatprep.subr.bf16.mxu0 %v887_v30  ;;  %1977 = vmatprep.subr.bf16.mxu1 %v887_v30  ;;  %v816_v30 = vld [vmem:[%s2463_s14 + $0x8] sm:$0xff] }
 0x151   : > { %v746_v32 = vpop.f32.mrb[19].mxu0  ;;  %1816 = vmatpush3.bf16.msra.mxu0 %v879_v6  ;;  %1985 = vmatpush3.bf16.msra.mxu1 %v879_v6  ;;  %v2099_v6 = vld [vmem:[%s2461_s13 + $0xa4] ss:$8 sps:$4 sm:$0xff]  }
 0x152   : > { %v888_v33 = vpack.c.bf16 %v1958_v31, %v746_v32 }
 0x154   : > { %v1961_v34 = vpop.f32.mrb[20].mxu0  ;;  %1817 = vmatprep.subr.bf16.mxu0 %v888_v33  ;;  %1978 = vmatprep.subr.bf16.mxu1 %v888_v33 }
 0x155   : > { %v756_v35 = vpop.f32.mrb[21].mxu0  ;;  %1818 = vmatpush3.bf16.msra.mxu0 %v880_v9  ;;  %1986 = vmatpush3.bf16.msra.mxu1 %v880_v9  ;;  %v2107_v9 = vld [vmem:[%s2461_s13 + $0xb0] ss:$8 sps:$4 sm:$0xff]  }
 0x156   : > { %v889_v36 = vpack.c.bf16 %v1961_v34, %v756_v35 }
 0x158   : > { %v1964_v37 = vpop.f32.mrb[22].mxu0  ;;  %1819 = vmatprep.subr.bf16.mxu0 %v889_v36  ;;  %1979 = vmatprep.subr.bf16.mxu1 %v889_v36 }
 0x159   : > { %v766_v38 = vpop.f32.mrb[23].mxu0  ;;  %1820 = vmatpush3.bf16.msra.mxu0 %v881_v12  ;;  %1987 = vmatpush3.bf16.msra.mxu1 %v881_v12  ;;  %v2117_v12 = vld [vmem:[%s2461_s13 + $0xd4] ss:$8 sps:$4 sm:$0xff]  }
 0x15a   : > { %v890_v39 = vpack.c.bf16 %v1964_v37, %v766_v38 }
 0x15c   : > { %v1967_v40 = vpop.f32.mrb[24].mxu0  ;;  %1821 = vmatprep.subr.bf16.mxu0 %v890_v39  ;;  %1980 = vmatprep.subr.bf16.mxu1 %v890_v39 }
 0x15d   : > { %v776_v41 = vpop.f32.mrb[25].mxu0  ;;  %1822 = vmatpush3.bf16.msra.mxu0 %v882_v15  ;;  %1988 = vmatpush3.bf16.msra.mxu1 %v882_v15  ;;  %v2125_v15 = vld [vmem:[%s2461_s13 + $0xe0] ss:$8 sps:$4 sm:$0xff]  }
 0x15e   : > { %v891_v42 = vpack.c.bf16 %v1967_v40, %v776_v41  ;;  %v827_v40 = vld [vmem:[%s2463_s14 + $0x60] sm:$0xff] }
 0x160   : > { %v1970_v43 = vpop.f32.mrb[26].mxu0  ;;  %1823 = vmatprep.subr.bf16.mxu0 %v891_v42  ;;  %1981 = vmatprep.subr.bf16.mxu1 %v891_v42  ;;  %v817_v42 = vld [vmem:[%s2463_s14 + $0x10] sm:$0xff] }
 0x161   : > { %v786_v44 = vpop.f32.mrb[27].mxu0  ;;  %1824 = vmatpush3.bf16.msra.mxu0 %v883_v18  ;;  %1989 = vmatpush3.bf16.msra.mxu1 %v883_v18 }
 0x162   : > { %v892_v45 = vpack.c.bf16 %v1970_v43, %v786_v44 }
 0x164   : > { %v1973_v46 = vpop.f32.mrb[28].mxu0  ;;  %1825 = vmatprep.subr.bf16.mxu0 %v892_v45  ;;  %1982 = vmatprep.subr.bf16.mxu1 %v892_v45 }
 0x165   : > { %v796_v47 = vpop.f32.mrb[29].mxu0  ;;  %1826 = vmatpush3.bf16.msra.mxu0 %v884_v21  ;;  %1990 = vmatpush3.bf16.msra.mxu1 %v884_v21 }
 0x166   : > { %v893_v48 = vpack.c.bf16 %v1973_v46, %v796_v47 }
 0x168   : > { %v1976_v49 = vpop.f32.mrb[30].mxu0  ;;  %1827 = vmatprep.subr.bf16.mxu0 %v893_v48  ;;  %1983 = vmatprep.subr.bf16.mxu1 %v893_v48  ;;  %v828_v48 = vld [vmem:[%s2463_s14 + $0x68] sm:$0xff] }
 0x169   : > { %v806_v50 = vpop.f32.mrb[31].mxu0  ;;  %1828 = vmatpush3.bf16.msra.mxu0 %v885_v24  ;;  %1991 = vmatpush3.bf16.msra.mxu1 %v885_v24 }
 0x16a   : > { %v894_v51 = vpack.c.bf16 %v1976_v49, %v806_v50  ;;  %v818_v50 = vld [vmem:[%s2463_s14 + $0x18] sm:$0xff] }
 0x16c   : > { %1829 = vmatprep.subr.bf16.mxu0 %v894_v51  ;;  %1984 = vmatprep.subr.bf16.mxu1 %v894_v51 }
 0x16d   : > { %1830 = vmatpush3.bf16.msra.mxu0 %v886_v27  ;;  %1992 = vmatpush3.bf16.msra.mxu1 %v886_v27 }
 0x170   : > { %1128 = vmatmul.mubr.bf16.vlgmr.msra.gmra.mrb[0].mxu1 %v2084_v52  ;;  %1088 = vmatmul.mubr.bf16.vlgmr.msra.gmra.mrb[32].mxu0 %v2102_v53 }
 0x171   : > { %1135 = vmatprep.mubr.bf16.mxu1 %v2087_v54  ;;  %1095 = vmatprep.mubr.bf16.mxu0 %v2108_v55 }
 0x178   : > { %1136 = vmatmul.mubr.bf16.gmra.mrb[4].mxu1 %v2089_v56  ;;  %1096 = vmatmul.mubr.bf16.gmra.mrb[36].mxu0 %v2110_v57 }
 0x179   : > { %1143 = vmatprep.mubr.bf16.mxu1 %v2090_v58  ;;  %1103 = vmatprep.mubr.bf16.mxu0 %v2114_v59 }
 0x180   : > { %1144 = vmatmul.mubr.bf16.gmra.mrb[8].mxu1 %v2092_v60  ;;  %1104 = vmatmul.mubr.bf16.gmra.mrb[40].mxu0 %v2116_v61  ;;  %v829_v60 = vld [vmem:[%s2463_s14 + $0x70] sm:$0xff] }
 0x181   : > { %1151 = vmatprep.mubr.bf16.mxu1 %v2093_v62  ;;  %1111 = vmatprep.mubr.bf16.mxu0 %v2120_v63  ;;  %v819_v62 = vld [vmem:[%s2463_s14 + $0x20] sm:$0xff] }
 0x188   : > { %1152 = vmatmul.mubr.bf16.gmra.mrb[12].mxu1 %v2095_v0  ;;  %1112 = vmatmul.mubr.bf16.gmra.mrb[44].mxu0 %v2122_v1 }
 0x189   : > { %1159 = vmatprep.mubr.bf16.mxu1 %v2096_v2  ;;  %1119 = vmatprep.mubr.bf16.mxu0 %v2126_v3 }
 0x190   : > { %1160 = vmatmul.mubr.bf16.gmra.mrb[16].mxu1 %v2098_v4  ;;  %1120 = vmatmul.mubr.bf16.gmra.mrb[48].mxu0 %v2128_v5  ;;  %v830_v4 = vld [vmem:[%s2463_s14 + $0x78] sm:$0xff] }
 0x191   : > { %1167 = vmatprep.mubr.bf16.mxu1 %v2099_v6  ;;  %v820_v6 = vld [vmem:[%s2463_s14 + $0x28] sm:$0xff] }
 0x198   : > { %1168 = vmatmul.mubr.bf16.gmra.mrb[20].mxu1 %v2101_v7 }
 0x199   : > { %1175 = vmatprep.mubr.bf16.mxu1 %v2105_v8 }
 0x1a0   : > { %1176 = vmatmul.mubr.bf16.gmra.mrb[24].mxu1 %v2107_v9 }
 0x1a1   : > { %1183 = vmatprep.mubr.bf16.mxu1 %v2111_v10 }
 0x1a8   : > { %1184 = vmatmul.mubr.bf16.gmra.mrb[28].mxu1 %v2113_v11 }
 0x1a9   : > { %1191 = vmatprep.mubr.bf16.mxu1 %v2117_v12 }
 0x1b0   : > { %1192 = vmatmul.mubr.bf16.gmra.mrb[32].mxu1 %v2119_v13 }
 0x1b1   : > { %1199 = vmatprep.mubr.bf16.mxu1 %v2123_v14 }
 0x1b8   : > { %1200 = vmatmul.mubr.bf16.gmra.mrb[36].mxu1 %v2125_v15 }
 0x1b9   : > { %1207 = vmatprep.mubr.bf16.mxu1 %v2129_v16  ;;  %v831_v16 = vld [vmem:[%s2463_s14 + $0x80] sm:$0xff] }
 0x1c0   : > { %1208 = vmatmul.mubr.bf16.gmra.mrb[40].mxu1 %v2131_v17 }
 0x243   : > { %v1861_v18 = vpop.f32.mrb[0].mxu1  ;;  %v1831_v19 = vpop.f32.mrb[32].mxu0 }
 0x244   : > { %v1862_v21 = vpop.f32.mrb[1].mxu1  ;;  %v1832_v23 = vpop.f32.mrb[33].mxu0 }
 0x245   : > { %v1863_v24 = vadd.f32 %v1862_v21, %v1861_v18  ;;  %v1864_v25 = vpop.f32.mrb[2].mxu1  ;;  %v1833_v26 = vadd.f32 %v1832_v23, %v1831_v19  ;;  %v1834_v27 = vpop.f32.mrb[34].mxu0  ;;  %v821_v18 = vld [vmem:[%s2463_s14 + $0x30] sm:$0xff] }
 0x246   : > { %v1865_v29 = vpop.f32.mrb[3].mxu1  ;;  %v1835_v31 = vpop.f32.mrb[35].mxu0 }
 0x247   : > { %v1226_v32 = vadd.f32 %v1863_v24, %v825_v20  ;;  %v1866_v33 = vadd.f32 %v1865_v29, %v1864_v25  ;;  %v1216_v34 = vadd.f32 %v1833_v26, %v815_v22  ;;  %v1836_v35 = vadd.f32 %v1835_v31, %v1834_v27  ;;  %v832_v24 = vld [vmem:[%s2463_s14 + $0x88] sm:$0xff]  ;;  %v822_v26 = vld [vmem:[%s2463_s14 + $0x38] sm:$0xff] }
 0x249   : > { %1258 = vst [vmem:[%s2463_s14 + $0x50] sm:$0xff] %v1226_v32  ;;  %v1227_v36 = vadd.f32 %v1866_v33, %v826_v28  ;;  %1248 = vst [vmem:[%s2463_s14] sm:$0xff] %v1216_v34  ;;  %v1217_v37 = vadd.f32 %v1836_v35, %v816_v30 }
 0x24b   : > { %1259 = vst [vmem:[%s2463_s14 + $0x58] sm:$0xff] %v1227_v36  ;;  %v1867_v38 = vpop.f32.mrb[4].mxu1  ;;  %1249 = vst [vmem:[%s2463_s14 + $0x8] sm:$0xff] %v1217_v37  ;;  %v1837_v39 = vpop.f32.mrb[36].mxu0  ;;  %v833_v36 = vld [vmem:[%s2463_s14 + $0x90] sm:$0xff] }
 0x24c   : > { %v1868_v41 = vpop.f32.mrb[5].mxu1  ;;  %v1838_v43 = vpop.f32.mrb[37].mxu0 }
 0x24d   : > { %v1869_v44 = vadd.f32 %v1868_v41, %v1867_v38  ;;  %v1870_v45 = vpop.f32.mrb[6].mxu1  ;;  %v1839_v46 = vadd.f32 %v1838_v43, %v1837_v39  ;;  %v1840_v47 = vpop.f32.mrb[38].mxu0  ;;  %v823_v38 = vld [vmem:[%s2463_s14 + $0x40] sm:$0xff] }
 0x24e   : > { %v1871_v49 = vpop.f32.mrb[7].mxu1  ;;  %v1841_v51 = vpop.f32.mrb[39].mxu0 }
 0x24f   : > { %v1228_v52 = vadd.f32 %v1869_v44, %v827_v40  ;;  %v1872_v53 = vadd.f32 %v1871_v49, %v1870_v45  ;;  %v1218_v54 = vadd.f32 %v1839_v46, %v817_v42  ;;  %v1842_v55 = vadd.f32 %v1841_v51, %v1840_v47  ;;  %v834_v44 = vld [vmem:[%s2463_s14 + $0x98] sm:$0xff]  ;;  %v824_v46 = vld [vmem:[%s2463_s14 + $0x48] sm:$0xff] }
 0x251   : > { %1260 = vst [vmem:[%s2463_s14 + $0x60] sm:$0xff] %v1228_v52  ;;  %v1229_v56 = vadd.f32 %v1872_v53, %v828_v48  ;;  %1250 = vst [vmem:[%s2463_s14 + $0x10] sm:$0xff] %v1218_v54  ;;  %v1219_v57 = vadd.f32 %v1842_v55, %v818_v50  ;;  %v835_v55 = vld [vmem:[%s2463_s14 + $0xa0] sm:$0xff] }
 0x253   : > { %1261 = vst [vmem:[%s2463_s14 + $0x68] sm:$0xff] %v1229_v56  ;;  %v1873_v58 = vpop.f32.mrb[8].mxu1  ;;  %1251 = vst [vmem:[%s2463_s14 + $0x18] sm:$0xff] %v1219_v57  ;;  %v1843_v59 = vpop.f32.mrb[40].mxu0 }
 0x254   : > { %v1874_v61 = vpop.f32.mrb[9].mxu1  ;;  %v1844_v63 = vpop.f32.mrb[41].mxu0 }
 0x255   : > { %v1875_v0 = vadd.f32 %v1874_v61, %v1873_v58  ;;  %v1876_v1 = vpop.f32.mrb[10].mxu1  ;;  %v1845_v2 = vadd.f32 %v1844_v63, %v1843_v59  ;;  %v1846_v3 = vpop.f32.mrb[42].mxu0  ;;  %v836_v59 = vld [vmem:[%s2463_s14 + $0xa8] sm:$0xff] }
 0x256   : > { %v1877_v5 = vpop.f32.mrb[11].mxu1  ;;  %v1847_v7 = vpop.f32.mrb[43].mxu0 }
 0x257   : > { %v1230_v8 = vadd.f32 %v1875_v0, %v829_v60  ;;  %v1878_v9 = vadd.f32 %v1877_v5, %v1876_v1  ;;  %v1220_v10 = vadd.f32 %v1845_v2, %v819_v62  ;;  %v1848_v11 = vadd.f32 %v1847_v7, %v1846_v3  ;;  %v837_v1 = vld [vmem:[%s2463_s14 + $0xb0] sm:$0xff]  ;;  %v838_v5 = vld [vmem:[%s2463_s14 + $0xb8] sm:$0xff] }
 0x259   : > { %1262 = vst [vmem:[%s2463_s14 + $0x70] sm:$0xff] %v1230_v8  ;;  %v1231_v12 = vadd.f32 %v1878_v9, %v830_v4  ;;  %1252 = vst [vmem:[%s2463_s14 + $0x20] sm:$0xff] %v1220_v10  ;;  %v1221_v13 = vadd.f32 %v1848_v11, %v820_v6  ;;  %v839_v11 = vld [vmem:[%s2463_s14 + $0xc0] sm:$0xff] }
 0x25b   : > { %1263 = vst [vmem:[%s2463_s14 + $0x78] sm:$0xff] %v1231_v12  ;;  %v1879_v14 = vpop.f32.mrb[12].mxu1  ;;  %1253 = vst [vmem:[%s2463_s14 + $0x28] sm:$0xff] %v1221_v13  ;;  %v1849_v15 = vpop.f32.mrb[44].mxu0 }
 0x25c   : > { %v1880_v17 = vpop.f32.mrb[13].mxu1  ;;  %v1850_v19 = vpop.f32.mrb[45].mxu0 }
 0x25d   : > { %v1881_v20 = vadd.f32 %v1880_v17, %v1879_v14  ;;  %v1882_v21 = vpop.f32.mrb[14].mxu1  ;;  %v1851_v22 = vadd.f32 %v1850_v19, %v1849_v15  ;;  %v1852_v23 = vpop.f32.mrb[46].mxu0  ;;  %v840_v15 = vld [vmem:[%s2463_s14 + $0xc8] sm:$0xff] }
 0x25e   : > { %v1883_v25 = vpop.f32.mrb[15].mxu1  ;;  %v1853_v27 = vpop.f32.mrb[47].mxu0 }
 0x25f   : > { %v1232_v28 = vadd.f32 %v1881_v20, %v831_v16  ;;  %v1884_v29 = vadd.f32 %v1883_v25, %v1882_v21  ;;  %v1222_v30 = vadd.f32 %v1851_v22, %v821_v18  ;;  %v1854_v31 = vadd.f32 %v1853_v27, %v1852_v23  ;;  %v841_v21 = vld [vmem:[%s2463_s14 + $0xd0] sm:$0xff]  ;;  %v842_v25 = vld [vmem:[%s2463_s14 + $0xd8] sm:$0xff] }
 0x261   : > { %1264 = vst [vmem:[%s2463_s14 + $0x80] sm:$0xff] %v1232_v28  ;;  %v1233_v32 = vadd.f32 %v1884_v29, %v832_v24  ;;  %1254 = vst [vmem:[%s2463_s14 + $0x30] sm:$0xff] %v1222_v30  ;;  %v1223_v33 = vadd.f32 %v1854_v31, %v822_v26  ;;  %v843_v31 = vld [vmem:[%s2463_s14 + $0xe0] sm:$0xff] }
 0x263   : > { %1265 = vst [vmem:[%s2463_s14 + $0x88] sm:$0xff] %v1233_v32  ;;  %v1885_v34 = vpop.f32.mrb[16].mxu1  ;;  %1255 = vst [vmem:[%s2463_s14 + $0x38] sm:$0xff] %v1223_v33  ;;  %v1855_v35 = vpop.f32.mrb[48].mxu0 }
 0x264   : > { %v1886_v37 = vpop.f32.mrb[17].mxu1  ;;  %v1856_v39 = vpop.f32.mrb[49].mxu0 }
 0x265   : > { %v1887_v40 = vadd.f32 %v1886_v37, %v1885_v34  ;;  %v1888_v41 = vpop.f32.mrb[18].mxu1  ;;  %v1857_v42 = vadd.f32 %v1856_v39, %v1855_v35  ;;  %v1858_v43 = vpop.f32.mrb[50].mxu0  ;;  %v844_v35 = vld [vmem:[%s2463_s14 + $0xe8] sm:$0xff] }
 0x266   : > { %v1889_v45 = vpop.f32.mrb[19].mxu1  ;;  %v1859_v47 = vpop.f32.mrb[51].mxu0 }
 0x267   : > { %v1234_v48 = vadd.f32 %v1887_v40, %v833_v36  ;;  %v1890_v49 = vadd.f32 %v1889_v45, %v1888_v41  ;;  %v1224_v50 = vadd.f32 %v1857_v42, %v823_v38  ;;  %v1860_v51 = vadd.f32 %v1859_v47, %v1858_v43  ;;  %v845_v41 = vld [vmem:[%s2463_s14 + $0xf0] sm:$0xff]  ;;  %v846_v45 = vld [vmem:[%s2463_s14 + $0xf8] sm:$0xff] }
 0x269   : > { %1266 = vst [vmem:[%s2463_s14 + $0x90] sm:$0xff] %v1234_v48  ;;  %v1235_v52 = vadd.f32 %v1890_v49, %v834_v44  ;;  %1256 = vst [vmem:[%s2463_s14 + $0x40] sm:$0xff] %v1224_v50  ;;  %v1225_v53 = vadd.f32 %v1860_v51, %v824_v46  ;;  %v1318_v50 = vld [vmem:[%s2454_s5 + $0x10] sm:$0xff] (!%p1774_p6)  ;;  %v1316_v51 = vld [vmem:[%s2454_s5] sm:$0xff] (!%p1774_p6) }
 0x26b   : > { %1267 = vst [vmem:[%s2463_s14 + $0x98] sm:$0xff] %v1235_v52  ;;  %v1891_v54 = vpop.f32.mrb[20].mxu1  ;;  %1257 = vst [vmem:[%s2463_s14 + $0x48] sm:$0xff] %v1225_v53  ;;  %v2247_v52 = vmov (!%p1774_p6), 0   ;;  %v1319_v53 = vld [vmem:[%s2454_s5 + $0x18] sm:$0xff] (!%p1774_p6) }
 0x26c   : > { %v1892_v56 = vpop.f32.mrb[21].mxu1  ;;  %2133 = vset.pattern.permute.xlu1 (!%p1774_p6), %v2247_v52  ;;  %2132 = vset.pattern.permute.xlu0 (!%p1774_p6), %v2247_v52 }
 0x26d   : > { %v1893_v57 = vadd.f32 %v1892_v56, %v1891_v54  ;;  %v1894_v58 = vpop.f32.mrb[22].mxu1  ;;  %1360 = vperm.xlu1 (!%p1774_p6), %2133, %v1318_v50   ;;  %1350 = vperm.xlu0 (!%p1774_p6), %2132, %v1316_v51   ;;  %v1317_v54 = vld [vmem:[%s2454_s5 + $0x8] sm:$0xff] (!%p1774_p6)  ;;  %v1320_v56 = vld [vmem:[%s2454_s5 + $0x20] sm:$0xff] (!%p1774_p6) }
 0x26e   : > { %v1895_v60 = vpop.f32.mrb[23].mxu1  ;;  %v1294_v50 = vld [vmem:[%s2463_s14 + $0x50] sm:$0xff] (!%p1774_p6) }
 0x26f   : > { %v1236_v61 = vadd.f32 %v1893_v57, %v835_v55  ;;  %v1896_v62 = vadd.f32 %v1895_v60, %v1894_v58  ;;  %v1321_v55 = vld [vmem:[%s2454_s5 + $0x28] sm:$0xff] (!%p1774_p6)  ;;  %v1323_v57 = vld [vmem:[%s2454_s5 + $0x38] sm:$0xff] (!%p1774_p6)  ;;  %v1322_v58 = vld [vmem:[%s2454_s5 + $0x30] sm:$0xff] (!%p1774_p6) }
 0x270   : > { %v1324_v60 = vld [vmem:[%s2454_s5 + $0x40] sm:$0xff] (!%p1774_p6) }
 0x271   : > { %1268 = vst [vmem:[%s2463_s14 + $0xa0] sm:$0xff] %v1236_v61  ;;  %v1237_v63 = vadd.f32 %v1896_v62, %v836_v59  ;;  %1365 = vperm.xlu1 (!%p1774_p6), %2133, %v1319_v53   ;;  %1355 = vperm.xlu0 (!%p1774_p6), %2132, %v1317_v54   ;;  %v1325_v59 = vld [vmem:[%s2454_s5 + $0x48] sm:$0xff] (!%p1774_p6)  ;;  %v1327_v61 = vld [vmem:[%s2454_s5 + $0x58] sm:$0xff] (!%p1774_p6)  ;;  %v1326_v62 = vld [vmem:[%s2454_s5 + $0x50] sm:$0xff] (!%p1774_p6) }
 0x273   : > { %1269 = vst [vmem:[%s2463_s14 + $0xa8] sm:$0xff] %v1237_v63  ;;  %v1897_v0 = vpop.f32.mrb[24].mxu1  ;;  %v1329_v63 = vld [vmem:[%s2454_s5 + $0x68] sm:$0xff] (!%p1774_p6) }
 0x274   : > { %v1898_v2 = vpop.f32.mrb[25].mxu1 }
 0x275   : > { %v1899_v3 = vadd.f32 %v1898_v2, %v1897_v0  ;;  %v1900_v4 = vpop.f32.mrb[26].mxu1  ;;  %1375 = vperm.xlu1 (!%p1774_p6), %2133, %v1321_v55   ;;  %1370 = vperm.xlu0 (!%p1774_p6), %2132, %v1320_v56   ;;  %v1328_v0 = vld [vmem:[%s2454_s5 + $0x60] sm:$0xff] (!%p1774_p6)  ;;  %v1330_v2 = vld [vmem:[%s2454_s5 + $0x70] sm:$0xff] (!%p1774_p6)  ;;  %v1297_v55 = vld [vmem:[%s2463_s14 + $0x68] sm:$0xff] (!%p1774_p6) }
 0x276   : > { %v1901_v6 = vpop.f32.mrb[27].mxu1  ;;  %v1296_v56 = vld [vmem:[%s2463_s14 + $0x60] sm:$0xff] (!%p1774_p6) }
 0x277   : > { %v1238_v7 = vadd.f32 %v1899_v3, %v837_v1  ;;  %v1902_v8 = vadd.f32 %v1901_v6, %v1900_v4  ;;  %v1331_v1 = vld [vmem:[%s2454_s5 + $0x78] sm:$0xff] (!%p1774_p6)  ;;  %v1333_v3 = vld [vmem:[%s2454_s5 + $0x88] sm:$0xff] (!%p1774_p6)  ;;  %v1332_v4 = vld [vmem:[%s2454_s5 + $0x80] sm:$0xff] (!%p1774_p6) }
 0x278   : > { %v1334_v6 = vld [vmem:[%s2454_s5 + $0x90] sm:$0xff] (!%p1774_p6) }
 0x279   : > { %1270 = vst [vmem:[%s2463_s14 + $0xb0] sm:$0xff] %v1238_v7  ;;  %v1239_v9 = vadd.f32 %v1902_v8, %v838_v5  ;;  %1385 = vperm.xlu1 (!%p1774_p6), %2133, %v1323_v57   ;;  %1380 = vperm.xlu0 (!%p1774_p6), %2132, %v1322_v58   ;;  %v1335_v5 = vld [vmem:[%s2454_s5 + $0x98] sm:$0xff] (!%p1774_p6)  ;;  %v1337_v7 = vld [vmem:[%s2454_s5 + $0xa8] sm:$0xff] (!%p1774_p6)  ;;  %v1336_v8 = vld [vmem:[%s2454_s5 + $0xa0] sm:$0xff] (!%p1774_p6) }
 0x27b   : > { %1271 = vst [vmem:[%s2463_s14 + $0xb8] sm:$0xff] %v1239_v9  ;;  %v1903_v10 = vpop.f32.mrb[28].mxu1  ;;  %v1339_v9 = vld [vmem:[%s2454_s5 + $0xb8] sm:$0xff] (!%p1774_p6) }
 0x27c   : > { %v1904_v12 = vpop.f32.mrb[29].mxu1 }
 0x27d   : > { %v1905_v13 = vadd.f32 %v1904_v12, %v1903_v10  ;;  %v1906_v14 = vpop.f32.mrb[30].mxu1  ;;  %1395 = vperm.xlu1 (!%p1774_p6), %2133, %v1325_v59   ;;  %1390 = vperm.xlu0 (!%p1774_p6), %2132, %v1324_v60   ;;  %v1338_v10 = vld [vmem:[%s2454_s5 + $0xb0] sm:$0xff] (!%p1774_p6)  ;;  %v1340_v12 = vld [vmem:[%s2454_s5 + $0xc0] sm:$0xff] (!%p1774_p6) }
 0x27e   : > { %v1907_v16 = vpop.f32.mrb[31].mxu1 }
 0x27f   : > { %v1240_v17 = vadd.f32 %v1905_v13, %v839_v11  ;;  %v1908_v18 = vadd.f32 %v1907_v16, %v1906_v14  ;;  %v1341_v11 = vld [vmem:[%s2454_s5 + $0xc8] sm:$0xff] (!%p1774_p6)  ;;  %v1343_v13 = vld [vmem:[%s2454_s5 + $0xd8] sm:$0xff] (!%p1774_p6)  ;;  %v1342_v14 = vld [vmem:[%s2454_s5 + $0xd0] sm:$0xff] (!%p1774_p6) }
 0x280   : > { %v1344_v16 = vld [vmem:[%s2454_s5 + $0xe0] sm:$0xff] (!%p1774_p6) }
 0x281   : > { %1272 = vst [vmem:[%s2463_s14 + $0xc0] sm:$0xff] %v1240_v17  ;;  %v1241_v19 = vadd.f32 %v1908_v18, %v840_v15  ;;  %1405 = vperm.xlu1 (!%p1774_p6), %2133, %v1327_v61   ;;  %1400 = vperm.xlu0 (!%p1774_p6), %2132, %v1326_v62   ;;  %v1345_v15 = vld [vmem:[%s2454_s5 + $0xe8] sm:$0xff] (!%p1774_p6)  ;;  %v1347_v17 = vld [vmem:[%s2454_s5 + $0xf8] sm:$0xff] (!%p1774_p6)  ;;  %v1346_v18 = vld [vmem:[%s2454_s5 + $0xf0] sm:$0xff] (!%p1774_p6) }
 0x282   : > { %v1299_v61 = vld [vmem:[%s2463_s14 + $0x78] sm:$0xff] (!%p1774_p6)  ;;  %v1298_v62 = vld [vmem:[%s2463_s14 + $0x70] sm:$0xff] (!%p1774_p6) }
 0x283   : > { %1273 = vst [vmem:[%s2463_s14 + $0xc8] sm:$0xff] %v1241_v19  ;;  %v1909_v20 = vpop.f32.mrb[32].mxu1  ;;  %v1286_v19 = vld [vmem:[%s2463_s14 + $0x10] sm:$0xff] (!%p1774_p6) }
 0x284   : > { %v1910_v22 = vpop.f32.mrb[33].mxu1 }
 0x285   : > { %v1911_v23 = vadd.f32 %v1910_v22, %v1909_v20  ;;  %v1912_v24 = vpop.f32.mrb[34].mxu1  ;;  %1415 = vperm.xlu1 (!%p1774_p6), %2133, %v1329_v63   ;;  %1410 = vperm.xlu0 (!%p1774_p6), %2132, %v1328_v0   ;;  %v1284_v20 = vld [vmem:[%s2463_s14] sm:$0xff] (!%p1774_p6) }
 0x286   : > { %v1913_v26 = vpop.f32.mrb[35].mxu1 }
 0x287   : > { %v1242_v27 = vadd.f32 %v1911_v23, %v841_v21  ;;  %v1914_v28 = vadd.f32 %v1913_v26, %v1912_v24  ;;  %v1285_v26 = vld [vmem:[%s2463_s14 + $0x8] sm:$0xff] (!%p1774_p6) }
 0x289   : > { %1274 = vst [vmem:[%s2463_s14 + $0xd0] sm:$0xff] %v1242_v27  ;;  %v1243_v29 = vadd.f32 %v1914_v28, %v842_v25  ;;  %1425 = vperm.xlu1 (!%p1774_p6), %2133, %v1331_v1   ;;  %1420 = vperm.xlu0 (!%p1774_p6), %2132, %v1330_v2   ;;  %v1287_v25 = vld [vmem:[%s2463_s14 + $0x18] sm:$0xff] (!%p1774_p6) }
 0x28b   : > { %1275 = vst [vmem:[%s2463_s14 + $0xd8] sm:$0xff] %v1243_v29  ;;  %v1915_v30 = vpop.f32.mrb[36].mxu1 }
 0x28c   : > { %v1916_v32 = vpop.f32.mrb[37].mxu1 }
 0x28d   : > { %v1917_v33 = vadd.f32 %v1916_v32, %v1915_v30  ;;  %v1918_v34 = vpop.f32.mrb[38].mxu1  ;;  %1435 = vperm.xlu1 (!%p1774_p6), %2133, %v1333_v3   ;;  %1430 = vperm.xlu0 (!%p1774_p6), %2132, %v1332_v4   ;;  %v1288_v32 = vld [vmem:[%s2463_s14 + $0x20] sm:$0xff] (!%p1774_p6)  ;;  %v1301_v3 = vld [vmem:[%s2463_s14 + $0x88] sm:$0xff] (!%p1774_p6) }
 0x28e   : > { %v1919_v36 = vpop.f32.mrb[39].mxu1  ;;  %v1300_v4 = vld [vmem:[%s2463_s14 + $0x80] sm:$0xff] (!%p1774_p6) }
 0x28f   : > { %v1244_v37 = vadd.f32 %v1917_v33, %v843_v31  ;;  %v1920_v38 = vadd.f32 %v1919_v36, %v1918_v34  ;;  %v1289_v31 = vld [vmem:[%s2463_s14 + $0x28] sm:$0xff] (!%p1774_p6) }
 0x291   : > { %1276 = vst [vmem:[%s2463_s14 + $0xe0] sm:$0xff] %v1244_v37  ;;  %v1245_v39 = vadd.f32 %v1920_v38, %v844_v35  ;;  %1445 = vperm.xlu1 (!%p1774_p6), %2133, %v1335_v5   ;;  %1440 = vperm.xlu0 (!%p1774_p6), %2132, %v1334_v6   ;;  %v1291_v37 = vld [vmem:[%s2463_s14 + $0x38] sm:$0xff] (!%p1774_p6)  ;;  %v1290_v38 = vld [vmem:[%s2463_s14 + $0x30] sm:$0xff] (!%p1774_p6) }
 0x293   : > { %1277 = vst [vmem:[%s2463_s14 + $0xe8] sm:$0xff] %v1245_v39  ;;  %v1921_v40 = vpop.f32.mrb[40].mxu1 }
 0x294   : > { %v1922_v42 = vpop.f32.mrb[41].mxu1 }
 0x295   : > { %v1923_v43 = vadd.f32 %v1922_v42, %v1921_v40  ;;  %v1924_v44 = vpop.f32.mrb[42].mxu1  ;;  %1283 = sbr.rel (%p1774_p6) target bundleno = 812 (0x32c), region = 82  ;;  %1455 = vperm.xlu1 (!%p1774_p6), %2133, %v1337_v7   ;;  %1450 = vperm.xlu0 (!%p1774_p6), %2132, %v1336_v8  }
 0x296   : > { %v1925_v46 = vpop.f32.mrb[43].mxu1 }
 0x297   : > { %v1246_v47 = vadd.f32 %v1923_v43, %v845_v41  ;;  %v1926_v48 = vadd.f32 %v1925_v46, %v1924_v44  ;;  %v1293_v43 = vld [vmem:[%s2463_s14 + $0x48] sm:$0xff] (!%p1774_p6)  ;;  %v1292_v44 = vld [vmem:[%s2463_s14 + $0x40] sm:$0xff] (!%p1774_p6) }
 0x299   : > { %1278 = vst [vmem:[%s2463_s14 + $0xf0] sm:$0xff] %v1246_v47  ;;  %v1247_v49 = vadd.f32 %v1926_v48, %v846_v45  ;;  %1465 = vperm.xlu1 (!%p1774_p6), %2133, %v1339_v9   ;;  %1460 = vperm.xlu0 (!%p1774_p6), %2132, %v1338_v10   ;;  %v1303_v9 = vld [vmem:[%s2463_s14 + $0x98] sm:$0xff] (!%p1774_p6)  ;;  %v1302_v10 = vld [vmem:[%s2463_s14 + $0x90] sm:$0xff] (!%p1774_p6) }
 0x29b   : > { %1279 = vst [vmem:[%s2463_s14 + $0xf8] sm:$0xff] %v1247_v49  ;;  %v1295_v49 = vld [vmem:[%s2463_s14 + $0x58] sm:$0xff] (!%p1774_p6) }
 0x29d   : > { %1475 = vperm.xlu1 %2133, %v1341_v11   ;;  %1470 = vperm.xlu0 %2132, %v1340_v12  }
 0x2a1   : > { %1485 = vperm.xlu1 %2133, %v1343_v13   ;;  %1480 = vperm.xlu0 %2132, %v1342_v14  }
 0x2a5   : > { %1495 = vperm.xlu1 %2133, %v1345_v15   ;;  %1490 = vperm.xlu0 %2132, %v1344_v16   ;;  %v1305_v15 = vld [vmem:[%s2463_s14 + $0xa8] sm:$0xff]  ;;  %v1304_v16 = vld [vmem:[%s2463_s14 + $0xa0] sm:$0xff] }
 0x2a9   : > { %1505 = vperm.xlu1 %2133, %v1347_v17   ;;  %1500 = vperm.xlu0 %2132, %v1346_v18  }
 0x2ec   : > { %v1361_v21 = vpop.permute.xlu1 %1360  ;;  %v1351_v22 = vpop.permute.xlu0 %1350 }
 0x2ed   : > { %v1510_v23 = vmul.f32 %v1361_v21, %v1286_v19  ;;  %v1508_v24 = vmul.f32 %v1351_v22, %v1284_v20  ;;  %v1307_v21 = vld [vmem:[%s2463_s14 + $0xb8] sm:$0xff]  ;;  %v1306_v22 = vld [vmem:[%s2463_s14 + $0xb0] sm:$0xff] }
 0x2ef   : > { %1542 = vst [vmem:[%s2463_s14 + $0x10] sm:$0xff] %v1510_v23  ;;  %1540 = vst [vmem:[%s2463_s14] sm:$0xff] %v1508_v24 }
 0x2f0   : > { %v1366_v27 = vpop.permute.xlu1 %1365  ;;  %v1356_v28 = vpop.permute.xlu0 %1355 }
 0x2f1   : > { %v1511_v29 = vmul.f32 %v1366_v27, %v1287_v25  ;;  %v1509_v30 = vmul.f32 %v1356_v28, %v1285_v26  ;;  %v1309_v27 = vld [vmem:[%s2463_s14 + $0xc8] sm:$0xff]  ;;  %v1308_v28 = vld [vmem:[%s2463_s14 + $0xc0] sm:$0xff] }
 0x2f3   : > { %1543 = vst [vmem:[%s2463_s14 + $0x18] sm:$0xff] %v1511_v29  ;;  %1541 = vst [vmem:[%s2463_s14 + $0x8] sm:$0xff] %v1509_v30 }
 0x2f4   : > { %v1376_v33 = vpop.permute.xlu1 %1375  ;;  %v1371_v34 = vpop.permute.xlu0 %1370 }
 0x2f5   : > { %v1513_v35 = vmul.f32 %v1376_v33, %v1289_v31  ;;  %v1512_v36 = vmul.f32 %v1371_v34, %v1288_v32  ;;  %v1311_v33 = vld [vmem:[%s2463_s14 + $0xd8] sm:$0xff]  ;;  %v1310_v34 = vld [vmem:[%s2463_s14 + $0xd0] sm:$0xff] }
 0x2f7   : > { %1545 = vst [vmem:[%s2463_s14 + $0x28] sm:$0xff] %v1513_v35  ;;  %1544 = vst [vmem:[%s2463_s14 + $0x20] sm:$0xff] %v1512_v36 }
 0x2f8   : > { %v1386_v39 = vpop.permute.xlu1 %1385  ;;  %v1381_v40 = vpop.permute.xlu0 %1380 }
 0x2f9   : > { %v1515_v41 = vmul.f32 %v1386_v39, %v1291_v37  ;;  %v1514_v42 = vmul.f32 %v1381_v40, %v1290_v38  ;;  %v1313_v39 = vld [vmem:[%s2463_s14 + $0xe8] sm:$0xff]  ;;  %v1312_v40 = vld [vmem:[%s2463_s14 + $0xe0] sm:$0xff] }
 0x2fb   : > { %1547 = vst [vmem:[%s2463_s14 + $0x38] sm:$0xff] %v1515_v41  ;;  %1546 = vst [vmem:[%s2463_s14 + $0x30] sm:$0xff] %v1514_v42 }
 0x2fc   : > { %v1396_v45 = vpop.permute.xlu1 %1395  ;;  %v1391_v46 = vpop.permute.xlu0 %1390 }
 0x2fd   : > { %v1517_v47 = vmul.f32 %v1396_v45, %v1293_v43  ;;  %v1516_v48 = vmul.f32 %v1391_v46, %v1292_v44  ;;  %v1315_v45 = vld [vmem:[%s2463_s14 + $0xf8] sm:$0xff]  ;;  %v1314_v46 = vld [vmem:[%s2463_s14 + $0xf0] sm:$0xff] }
 0x2ff   : > { %1549 = vst [vmem:[%s2463_s14 + $0x48] sm:$0xff] %v1517_v47  ;;  %1548 = vst [vmem:[%s2463_s14 + $0x40] sm:$0xff] %v1516_v48 }
 0x300   : > { %v1406_v51 = vpop.permute.xlu1 %1405  ;;  %v1401_v52 = vpop.permute.xlu0 %1400 }
 0x301   : > { %v1519_v53 = vmul.f32 %v1406_v51, %v1295_v49  ;;  %v1518_v54 = vmul.f32 %v1401_v52, %v1294_v50 }
 0x303   : > { %1551 = vst [vmem:[%s2463_s14 + $0x58] sm:$0xff] %v1519_v53  ;;  %1550 = vst [vmem:[%s2463_s14 + $0x50] sm:$0xff] %v1518_v54 }
 0x304   : > { %v1416_v57 = vpop.permute.xlu1 %1415  ;;  %v1411_v58 = vpop.permute.xlu0 %1410 }
 0x305   : > { %v1521_v59 = vmul.f32 %v1416_v57, %v1297_v55  ;;  %v1520_v60 = vmul.f32 %v1411_v58, %v1296_v56 }
 0x307   : > { %1553 = vst [vmem:[%s2463_s14 + $0x68] sm:$0xff] %v1521_v59  ;;  %1552 = vst [vmem:[%s2463_s14 + $0x60] sm:$0xff] %v1520_v60 }
 0x308   : > { %v1426_v63 = vpop.permute.xlu1 %1425  ;;  %v1421_v0 = vpop.permute.xlu0 %1420 }
 0x309   : > { %v1523_v1 = vmul.f32 %v1426_v63, %v1299_v61  ;;  %v1522_v2 = vmul.f32 %v1421_v0, %v1298_v62 }
 0x30b   : > { %1555 = vst [vmem:[%s2463_s14 + $0x78] sm:$0xff] %v1523_v1  ;;  %1554 = vst [vmem:[%s2463_s14 + $0x70] sm:$0xff] %v1522_v2 }
 0x30c   : > { %v1436_v5 = vpop.permute.xlu1 %1435  ;;  %v1431_v6 = vpop.permute.xlu0 %1430 }
 0x30d   : > { %v1525_v7 = vmul.f32 %v1436_v5, %v1301_v3  ;;  %v1524_v8 = vmul.f32 %v1431_v6, %v1300_v4 }
 0x30f   : > { %1557 = vst [vmem:[%s2463_s14 + $0x88] sm:$0xff] %v1525_v7  ;;  %1556 = vst [vmem:[%s2463_s14 + $0x80] sm:$0xff] %v1524_v8 }
 0x310   : > { %v1446_v11 = vpop.permute.xlu1 %1445  ;;  %v1441_v12 = vpop.permute.xlu0 %1440 }
 0x311   : > { %v1527_v13 = vmul.f32 %v1446_v11, %v1303_v9  ;;  %v1526_v14 = vmul.f32 %v1441_v12, %v1302_v10 }
 0x313   : > { %1559 = vst [vmem:[%s2463_s14 + $0x98] sm:$0xff] %v1527_v13  ;;  %1558 = vst [vmem:[%s2463_s14 + $0x90] sm:$0xff] %v1526_v14 }
 0x314   : > { %v1456_v17 = vpop.permute.xlu1 %1455  ;;  %v1451_v18 = vpop.permute.xlu0 %1450 }
 0x315   : > { %v1529_v19 = vmul.f32 %v1456_v17, %v1305_v15  ;;  %v1528_v20 = vmul.f32 %v1451_v18, %v1304_v16 }
 0x317   : > { %1561 = vst [vmem:[%s2463_s14 + $0xa8] sm:$0xff] %v1529_v19  ;;  %1560 = vst [vmem:[%s2463_s14 + $0xa0] sm:$0xff] %v1528_v20 }
 0x318   : > { %v1466_v23 = vpop.permute.xlu1 %1465  ;;  %v1461_v24 = vpop.permute.xlu0 %1460 }
 0x319   : > { %v1531_v25 = vmul.f32 %v1466_v23, %v1307_v21  ;;  %v1530_v26 = vmul.f32 %v1461_v24, %v1306_v22 }
 0x31b   : > { %1563 = vst [vmem:[%s2463_s14 + $0xb8] sm:$0xff] %v1531_v25  ;;  %1562 = vst [vmem:[%s2463_s14 + $0xb0] sm:$0xff] %v1530_v26 }
 0x31c   : > { %v1476_v29 = vpop.permute.xlu1 %1475  ;;  %v1471_v30 = vpop.permute.xlu0 %1470 }
 0x31d   : > { %v1533_v31 = vmul.f32 %v1476_v29, %v1309_v27  ;;  %v1532_v32 = vmul.f32 %v1471_v30, %v1308_v28 }
 0x31f   : > { %1565 = vst [vmem:[%s2463_s14 + $0xc8] sm:$0xff] %v1533_v31  ;;  %1564 = vst [vmem:[%s2463_s14 + $0xc0] sm:$0xff] %v1532_v32 }
 0x320   : > { %v1486_v35 = vpop.permute.xlu1 %1485  ;;  %v1481_v36 = vpop.permute.xlu0 %1480 }
 0x321   : > { %v1535_v37 = vmul.f32 %v1486_v35, %v1311_v33  ;;  %v1534_v38 = vmul.f32 %v1481_v36, %v1310_v34 }
 0x323   : > { %1567 = vst [vmem:[%s2463_s14 + $0xd8] sm:$0xff] %v1535_v37  ;;  %1566 = vst [vmem:[%s2463_s14 + $0xd0] sm:$0xff] %v1534_v38 }
 0x324   : > { %v1496_v41 = vpop.permute.xlu1 %1495  ;;  %v1491_v42 = vpop.permute.xlu0 %1490 }
 0x325   : > { %v1537_v43 = vmul.f32 %v1496_v41, %v1313_v39  ;;  %v1536_v44 = vmul.f32 %v1491_v42, %v1312_v40 }
 0x327   : > { %1569 = vst [vmem:[%s2463_s14 + $0xe8] sm:$0xff] %v1537_v43  ;;  %1568 = vst [vmem:[%s2463_s14 + $0xe0] sm:$0xff] %v1536_v44 }
 0x328   : > { %v1506_v47 = vpop.permute.xlu1 %1505  ;;  %v1501_v48 = vpop.permute.xlu0 %1500 }
 0x329   : > { %v1539_v49 = vmul.f32 %v1506_v47, %v1315_v45  ;;  %v1538_v50 = vmul.f32 %v1501_v48, %v1314_v46 }
 0x32b   : > { %1571 = vst [vmem:[%s2463_s14 + $0xf8] sm:$0xff] %v1539_v49  ;;  %1570 = vst [vmem:[%s2463_s14 + $0xf0] sm:$0xff] %v1538_v50 }
 0x32c PF: > { %s1781_s20 = sshll.u32 %s2232_s21, 12  ;;  %s1586_s30 = sshll.u32 %s2463_s14, 4  ;;  %s2765_s30 = int_to_ptr.vmem [resolvable:$true] %s1586_s30 }
 0x32d   : > { %s2762_s26 = scalar_lea.hbm %s2831_s4, %s1781_s20  ;;  %s2842_s8 = sand.u32 1, %s2212_s16  }
 0x32e   : > { %s2769_s9 = scalar_lea.sflag [#allocation4], %s2842_s8  ;;  %s2134_s6 = scalar_lea.vmem %s2765_s30, 4096 }
 0x32f   : > { %p2135_p8 = scmp.ne.s32.totalorder %s2765_s30, %s2134_s6  ;;  %s2248_s21 = smov [#allocation3]  }
 0x330   : > { %s2138_s29 = sshll.u32 %s2248_s21, 4  ;;  %s2139_s29 = int_to_ptr.vmem [resolvable:$false] %s2138_s29 }
 0x331   : > { %p2136_p9 = pnand %p2135_p8, %p2348_p7  ;;  %s2140_s5 = scalar_lea.vmem %s2139_s29, 8192 }
 0x332   : > { %p2141_p11 = scmp.lt.s32.totalorder %s2765_s30, %s2139_s29  ;;  %p2142_p13 = scmp.lt.s32.totalorder %s2140_s5, %s2134_s6 }
 0x333   : > { %p2137_p10 = pneg %p2136_p9 }
 0x334   : > { %p2143_p0 = por %p2142_p13, %p2141_p11 }
 0x336   : > { %p2144_p1 = pnand %p2143_p0, %p2137_p10 }
 0x338   : > { %2147 = shalt.err (!%p2144_p1)
}
 0x339   : > { %s2148_s14 = scalar_lea.hbm %s2762_s26, 4096  ;;  %s2152_s1 = scalar_lea.hbm %s2831_s4, 8192 }
 0x33a   : > { %p2149_p2 = scmp.ne.s32.totalorder %s2762_s26, %s2148_s14  ;;  %p2153_p5 = scmp.lt.u32.totalorder %s2762_s26, %s2831_s4 }
 0x33b   : > { %p2154_p6 = scmp.lt.u32.totalorder %s2152_s1, %s2148_s14  ;;  %p2156_p9 = scmp.lt.u32.totalorder %s2148_s14, %s2762_s26 }
 0x33c   : > { %p2150_p3 = pnand %p2149_p2, %p2348_p7 }
 0x33d   : > { %p2155_p8 = por %p2154_p6, %p2153_p5 }
 0x33e   : > { %p2151_p4 = pneg %p2150_p3 }
 0x33f   : > { %p2157_p10 = por %p2156_p9, %p2155_p8 }
 0x341   : > { %p2158_p11 = pnand %p2157_p10, %p2151_p4 }
 0x343   : > { %2161 = shalt.err (!%p2158_p11)
}
 0x344   : > { %s2249_s28 = smov 128   ;;  %s2250_s25 = smov 8  }
 0x345   : > { %1993 = dma.vmem_to_hbm [thread:$0]  (%p2348_p7), %s2765_s30, 4096, %s2762_s26, %s2769_s9, %s2249_s28, %s2249_s28, %s2250_s25  }
 0x346 PF: > { %p1999_p13 = scmp.ge.s32.totalorder %s2244_s24, 2  ;;  %s1601_s8 = sand.u32 1, %s2208_s15  }
 0x347   : > { %s1602_s6 = scalar_lea.sflag [#allocation4], %s1601_s8 }
 0x348   : > { %p1996_p0 = pnand %p1999_p13, %p2356_p12 }
 0x34a   : > { %2203 = dma.done.wait (!%p1996_p0), %s1602_s6, 4096  }
 0x34b   : > { %2205 = vsyncadd (!%p1996_p0), %s1602_s6, 4294963200  ;;  %s17_s24 = sadd.s32 1, %s2244_s24   ;;  %s2843_s7 = sld [smem:[#allocation6_spill]] }
 0x34c   : > { %p14_p1 = scmp.ge.s32.totalorder %s17_s24, 6   ;;  %s2844_s26 = sld [smem:[#allocation7_spill]] }
 0x34d   : > { %s2845_s15 = smov %s2212_s16  ;;  %s2846_s16 = smov %s2216_s17 }
 0x34e   : > { %s2847_s17 = smov %s2361_s11  ;;  %s2848_s18 = smov %s2224_s19 }
 0x34f   : > { %s2849_s19 = smov %s2364_s12  ;;  %s2850_s20 = smov %s2236_s22 }
 0x350   : > { %s2851_s21 = smov %s2240_s23  ;;  %16 = sbr.rel (!%p14_p1) target bundleno = 8 (0x8), region = 128 }
 0x351   : > { %s2852_s22 = smov %s2843_s7 }
 0x352   : > { %s2853_s23 = smov %s2844_s26 }
 0x357   :  { %1607 = vsyncpa [#allocation4], 1 }
 0x358   :  { %1609 = vsyncpa [#allocation4 + $0x1], 1 }

</bundles_post_ra>
